<compile_context>
chip_gen: v7x
topology: tpu7x:2x2x1
jax: 0.10.0
libtpu: 0.0.40
codegen_flags: <defaults>
</compile_context>

<pallas_src>
import functools

import jax
import jax.numpy as jnp
from jax.experimental import pallas as pl
from jax.experimental.pallas import tpu as pltpu


# ---------------------------------------------------------------------------
# Kernel
# ---------------------------------------------------------------------------
def group_norm_kernel(x_ref, wt_ref, b_ref, gamma_ref, beta_ref, o_ref, *,
                      skip_weight, eps):
    """One node-tile of the group_norm forward.

    Shapes (Tn = node tile, B = batch, H = dim_hidden, G = num_groups):
      x_ref     : (B, Tn, H)   activations, original (batch, node, hidden) layout
      wt_ref    : (H, G)       group_func weight, pre-transposed, MXU dtype
      b_ref     : (1, G)       group_func bias (f32)
      gamma_ref : (Tn, G*H)    BatchNorm1d weight, free (N, G*H) view
      beta_ref  : (Tn, G*H)    BatchNorm1d bias,   free (N, G*H) view
      o_ref     : (B, Tn, H)   output
    """
    B, Tn, H = x_ref.shape
    G = wt_ref.shape[1]

    x = x_ref[...]                                   # model dtype (bf16 stays bf16)
    xf = x.astype(jnp.float32)

    # --- group_func logits: ONE merged MXU matmul (M=B*Tn, K=H, N=G) -------
    logits = jnp.dot(x.reshape(B * Tn, H), wt_ref[...],
                     preferred_element_type=jnp.float32) + b_ref[...]
    # --- softmax over groups, computed once --------------------------------
    logits = logits - jnp.max(logits, axis=-1, keepdims=True)
    e = jnp.exp(logits)
    score = (e / jnp.sum(e, axis=-1, keepdims=True)).reshape(B, Tn, G)   # f32

    gamma = gamma_ref[...].astype(jnp.float32)       # (Tn, G*H)
    beta = beta_ref[...].astype(jnp.float32)         # (Tn, G*H)

    inv_b = 1.0 / B
    c1 = jnp.zeros((B, Tn, H), jnp.float32)
    c2 = jnp.zeros((Tn, H), jnp.float32)

    # G is small: unrolled VPU multiply-accumulates (no tiny-M/tiny-K MXU work).
    for g in range(G):
        s_g = score[:, :, g:g + 1]                   # (B, Tn, 1)
        sx = s_g * xf                                # xt for group g     (B, Tn, H)
        m1 = jnp.sum(sx, axis=0) * inv_b             # E_b[xt]            (Tn, H)
        d = sx - m1[None]
        var = jnp.sum(d * d, axis=0) * inv_b         # biased var, two-pass (Tn, H)
        a_g = gamma[:, g * H:(g + 1) * H] * jax.lax.rsqrt(var + eps)
        c1 = c1 + s_g * a_g[None]                    # sum_g score_g * a_g
        c2 = c2 + (m1 * a_g - beta[:, g * H:(g + 1) * H])

    # sum_g BN(xt_g) = x * C1 - C2  ->  out = x + (x * C1 - C2) * skip_weight
    o_ref[...] = (xf + (xf * c1 - c2[None]) * skip_weight).astype(o_ref.dtype)


# ---------------------------------------------------------------------------
# Wrapper
# ---------------------------------------------------------------------------
def _round_up(v, m):
    return -(-v // m) * m


def _vmem_limit_bytes():
    """~75% of per-TensorCore VMEM capacity: ≈96 MiB on v5e/v6e (128 MiB parts,
    per the review's 'raise the budget'), ≈48 MiB on v7x (64 MiB per TC; the
    'parallel' grid runs one tile per core, each core has its own VMEM, so
    per-core accounting is the right one)."""
    try:
        cap = int(pltpu.get_tpu_info().vmem_capacity_bytes)
    except Exception:
        cap = 64 * 1024 * 1024        # conservative fallback
    return (cap * 3) // 4


def _pick_tile_n(n, b, h, g, x_itemsize, affine_itemsize, budget_bytes):
    """Largest node tile (multiple of 8 dividing N, or N itself) whose
    double-buffered, lane-padded working set fits the VMEM budget."""
    hp = _round_up(h, 128)            # minor-dim lane padding of (.., H) blocks
    gp = _round_up(g, 128)            # lane padding of the (.., G) score/logits
    ghp = _round_up(g * h, 128)       # lane padding of the (.., G*H) affine blocks

    def fits(tn):
        tns = _round_up(tn, 8)
        xio = 2 * 2 * b * tns * hp * x_itemsize        # x + out blocks, 2 buffers each
        aff = 2 * 2 * tns * ghp * affine_itemsize      # gamma + beta blocks, 2 buffers
        tmp = (4 * b * tns * hp                        # xf, sx, d, c1 (f32)
               + 2 * b * tns * gp                      # logits / score (f32)
               + 6 * tns * hp) * 4                     # m1, var, a_g, c2, ...
        return xio + aff + tmp <= budget_bytes

    if n % 8 != 0:
        return n                      # full-extent block is the only legal tiling
    cands = [t for t in range(n, 7, -1) if n % t == 0 and t % 8 == 0]
    for t in cands:
        if fits(t):
            return t
    return cands[-1] if cands else n


def group_norm_forward(x, group_w, group_b, bn_gamma, bn_beta, *,
                       num_nodes, num_groups, dim_hidden, skip_weight,
                       eps=1e-5, tile_n=None, affine_dtype=None,
                       buffer_count=None):
    B, N, H = x.shape
    G = num_groups
    assert N == num_nodes and H == dim_hidden
    assert G > 1, "num_groups == 1 branch not implemented"  # TODO(synk)

    # BN affine params streamed in the activation dtype (bf16 models get the
    # halved-traffic path for free); override via affine_dtype=jnp.bfloat16.
    if affine_dtype is None:
        affine_dtype = x.dtype

    vmem_limit = _vmem_limit_bytes()
    if tile_n is None:
        tile_n = _pick_tile_n(N, B, H, G, jnp.dtype(x.dtype).itemsize,
                              jnp.dtype(affine_dtype).itemsize, vmem_limit)
    assert N % tile_n == 0 and (tile_n % 8 == 0 or tile_n == N)
    grid = (N // tile_n,)

    # Layout plumbing is free (pure reshapes plus a tiny (G,H) weight transpose);
    # there are NO full-size HBM transposes of x or of the output.
    w_t = group_w.T.astype(x.dtype)                              # (H, G) MXU operand
    b_row = group_b.astype(jnp.float32).reshape(1, G)
    gamma2 = bn_gamma.astype(affine_dtype).reshape(N, G * H)     # free view
    beta2 = bn_beta.astype(affine_dtype).reshape(N, G * H)       # free view

    def tiled_spec(shape, index_map):
        if buffer_count is None:
            return pl.BlockSpec(shape, index_map)
        # Optional deeper pipeline (v5e/v6e only, after profiling shows exposed DMA).
        return pl.BlockSpec(shape, index_map, pipeline_mode=pl.Buffered(buffer_count))

    kernel = functools.partial(group_norm_kernel,
                               skip_weight=float(skip_weight), eps=float(eps))

    return pl.pallas_call(
        kernel,
        out_shape=jax.ShapeDtypeStruct((B, N, H), x.dtype),
        grid_spec=pltpu.PrefetchScalarGridSpec(
            num_scalar_prefetch=0,
            grid=grid,
            in_specs=[
                tiled_spec((B, tile_n, H), lambda i: (0, i, 0)),     # x tile
                pl.BlockSpec((H, G), lambda i: (0, 0)),              # group weight
                pl.BlockSpec((1, G), lambda i: (0, 0)),              # group bias
                tiled_spec((tile_n, G * H), lambda i: (i, 0)),       # gamma tile
                tiled_spec((tile_n, G * H), lambda i: (i, 0)),       # beta tile
            ],
            out_specs=pl.BlockSpec((B, tile_n, H), lambda i: (0, i, 0)),
        ),
        compiler_params=pltpu.CompilerParams(
            dimension_semantics=("parallel",),     # node tiles are independent
            vmem_limit_bytes=vmem_limit,
        ),
    )(x, w_t, b_row, gamma2, beta2)


# ---------------------------------------------------------------------------
# Pure-JAX reference mirroring the PyTorch forward (training-mode BN)
# ---------------------------------------------------------------------------
def group_norm_reference(x, group_w, group_b, bn_gamma, bn_beta, *,
                         num_nodes, num_groups, dim_hidden, skip_weight,
                         eps=1e-5):
    B = x.shape[0]
    logits = jnp.einsum('bnh,gh->bng', x, group_w) + group_b
    score = jax.nn.softmax(logits, axis=2)                           # (B, N, G)
    xt = score[:, :, :, None] * x[:, :, None, :]                     # (B, N, G, H)
    flat = xt.reshape(B, num_nodes * num_groups * dim_hidden)
    mean = jnp.mean(flat, axis=0, keepdims=True)
    var = jnp.mean((flat - mean) ** 2, axis=0, keepdims=True)        # biased
    flat_n = (flat - mean) / jnp.sqrt(var + eps) * bn_gamma + bn_beta
    xt_n = flat_n.reshape(B, num_nodes, num_groups, dim_hidden).sum(axis=2)
    return x + xt_n * skip_weight


if __name__ == "__main__":
    B, N, H, G = 4, 32, 16, 4        # batch, num_nodes, dim_hidden, num_groups
    skip_weight = 0.5

    key = jax.random.PRNGKey(0)
    kx, kw, kb, kg, kbt = jax.random.split(key, 5)

    x = jax.random.normal(kx, (B, N, H), dtype=jnp.float32)
    # Linear(dim_hidden, num_groups) params, torch-style uniform init range.
    bound = 1.0 / (H ** 0.5)
    group_w = jax.random.uniform(kw, (G, H), jnp.float32, -bound, bound)
    group_b = jax.random.uniform(kb, (G,), jnp.float32, -bound, bound)
    # BatchNorm1d(H*G*N) affine params (non-trivial, to exercise gamma/beta).
    bn_gamma = 1.0 + 0.1 * jax.random.normal(kg, (H * G * N,), dtype=jnp.float32)
    bn_beta = 0.1 * jax.random.normal(kbt, (H * G * N,), dtype=jnp.float32)

    kwargs = dict(num_nodes=N, num_groups=G, dim_hidden=H,
                  skip_weight=skip_weight)

    ref = group_norm_reference(x, group_w, group_b, bn_gamma, bn_beta, **kwargs)

    # f32, auto-picked tile (single block at this toy size).
    out = jax.block_until_ready(
        group_norm_forward(x, group_w, group_b, bn_gamma, bn_beta, **kwargs))
    assert out.shape == (B, N, H)
    # 1e-3 absorbs MXU-pass / accumulation-order differences; semantic errors
    # would be O(1).
    assert jnp.allclose(out, ref, atol=1e-3, rtol=1e-3), "mismatch vs reference"

    # Forced small tile -> multi-step pipelined grid.
    out_tiled = jax.block_until_ready(
        group_norm_forward(x, group_w, group_b, bn_gamma, bn_beta,
                           tile_n=8, **kwargs))
    assert jnp.allclose(out_tiled, ref, atol=1e-3, rtol=1e-3), \
        "mismatch vs reference (tiled)"

    # bf16 activations: bf16 MXU operands (no pre-cast to f32) and bf16-streamed
    # gamma/beta (halved affine-param HBM bytes).  Loose tolerance for end-to-end
    # bf16 rounding; semantic errors would still be O(1).
    x_bf = x.astype(jnp.bfloat16)
    ref_bf = group_norm_reference(x_bf.astype(jnp.float32), group_w, group_b,
                                  bn_gamma, bn_beta, **kwargs)
    out_bf = jax.block_until_ready(
        group_norm_forward(x_bf, group_w, group_b, bn_gamma, bn_beta, **kwargs))
    assert out_bf.dtype == jnp.bfloat16
    assert jnp.allclose(out_bf.astype(jnp.float32), ref_bf,
                        atol=1e-1, rtol=1e-1), "mismatch vs reference (bf16)"

    print("KERNEL_OK")
</pallas_src>

<mosaic_0001>
module attributes {stable_mosaic.version = 11 : i64} {
  func.func @group_norm_kernel(%arg0: i32, %arg1: memref<4x32x16xf32, #tpu.memory_space<vmem>>, %arg2: memref<16x4xf32, #tpu.memory_space<vmem>>, %arg3: memref<1x4xf32, #tpu.memory_space<vmem>>, %arg4: memref<32x64xf32, #tpu.memory_space<vmem>>, %arg5: memref<32x64xf32, #tpu.memory_space<vmem>>, %arg6: memref<4x32x16xf32, #tpu.memory_space<vmem>>) attributes {dimension_semantics = [#tpu.dimension_semantics<parallel>], iteration_bounds = array<i64: 1>, scalar_prefetch = 0 : i64, scratch_operands = 0 : i64, tpu.core_type = #tpu.core_type<tc>, window_params = [{transform_indices = @transform_0, window_bounds = array<i64: 4, 32, 16>}, {pipeline_mode = #tpu.pipeline_mode<synchronous>, transform_indices = @transform_1, window_bounds = array<i64: 16, 4>}, {pipeline_mode = #tpu.pipeline_mode<synchronous>, transform_indices = @transform_2, window_bounds = array<i64: 1, 4>}, {transform_indices = @transform_3, window_bounds = array<i64: 32, 64>}, {transform_indices = @transform_4, window_bounds = array<i64: 32, 64>}, {transform_indices = @transform_5, window_bounds = array<i64: 4, 32, 16>}]} {
    %c0 = arith.constant 0 : index
    %c0_0 = arith.constant 0 : index
    %c0_1 = arith.constant 0 : index
    %0 = vector.load %arg1[%c0, %c0_0, %c0_1] : memref<4x32x16xf32, #tpu.memory_space<vmem>>, vector<4x32x16xf32>
    %1 = vector.shape_cast %0 : vector<4x32x16xf32> to vector<128x16xf32>
    %c0_2 = arith.constant 0 : index
    %c0_3 = arith.constant 0 : index
    %2 = vector.load %arg2[%c0_2, %c0_3] : memref<16x4xf32, #tpu.memory_space<vmem>>, vector<16x4xf32>
    %cst = arith.constant dense<0.000000e+00> : vector<128x4xf32>
    %3 = tpu.matmul %1, %2, %cst {dimension_numbers = #tpu.dot_dimension_numbers<[1], [0], [0], [1], [0, 0, 1, 1], [], []>} : vector<128x16xf32>, vector<16x4xf32>, vector<128x4xf32> -> vector<128x4xf32>
    %c0_4 = arith.constant 0 : index
    %c0_5 = arith.constant 0 : index
    %4 = vector.load %arg3[%c0_4, %c0_5] : memref<1x4xf32, #tpu.memory_space<vmem>>, vector<1x4xf32>
    %5 = vector.broadcast %4 : vector<1x4xf32> to vector<128x4xf32>
    %6 = arith.addf %3, %5 : vector<128x4xf32>
    %cst_6 = arith.constant dense<0xFF800000> : vector<128xf32>
    %7 = vector.multi_reduction <maximumf>, %6, %cst_6 [1] : vector<128x4xf32> to vector<128xf32>
    %8 = vector.shape_cast %7 : vector<128xf32> to vector<128x1xf32>
    %9 = vector.broadcast %8 : vector<128x1xf32> to vector<128x4xf32>
    %10 = arith.subf %6, %9 : vector<128x4xf32>
    %11 = math.exp %10 : vector<128x4xf32>
    %cst_7 = arith.constant dense<0.000000e+00> : vector<128xf32>
    %12 = vector.multi_reduction <add>, %11, %cst_7 [1] : vector<128x4xf32> to vector<128xf32>
    %13 = vector.shape_cast %12 : vector<128xf32> to vector<128x1xf32>
    %14 = vector.broadcast %13 : vector<128x1xf32> to vector<128x4xf32>
    %15 = arith.divf %11, %14 : vector<128x4xf32>
    %16 = vector.shape_cast %15 : vector<128x4xf32> to vector<4x32x4xf32>
    %c0_8 = arith.constant 0 : index
    %c0_9 = arith.constant 0 : index
    %17 = vector.load %arg4[%c0_8, %c0_9] : memref<32x64xf32, #tpu.memory_space<vmem>>, vector<32x64xf32>
    %c0_10 = arith.constant 0 : index
    %c0_11 = arith.constant 0 : index
    %18 = vector.load %arg5[%c0_10, %c0_11] : memref<32x64xf32, #tpu.memory_space<vmem>>, vector<32x64xf32>
    %cst_12 = arith.constant 0.000000e+00 : f32
    %19 = vector.broadcast %cst_12 : f32 to vector<4x32x16xf32>
    %cst_13 = arith.constant 0.000000e+00 : f32
    %20 = vector.broadcast %cst_13 : f32 to vector<32x16xf32>
    %21 = vector.extract_strided_slice %16 {offsets = [0, 0, 0], sizes = [4, 32, 1], strides = [1, 1, 1]} : vector<4x32x4xf32> to vector<4x32x1xf32>
    %22 = vector.broadcast %21 : vector<4x32x1xf32> to vector<4x32x16xf32>
    %23 = arith.mulf %22, %0 : vector<4x32x16xf32>
    %cst_14 = arith.constant dense<0.000000e+00> : vector<32x16xf32>
    %24 = vector.multi_reduction <add>, %23, %cst_14 [0] : vector<4x32x16xf32> to vector<32x16xf32>
    %cst_15 = arith.constant 2.500000e-01 : f32
    %25 = vector.broadcast %cst_15 : f32 to vector<32x16xf32>
    %26 = arith.mulf %24, %25 : vector<32x16xf32>
    %27 = vector.shape_cast %26 : vector<32x16xf32> to vector<1x32x16xf32>
    %28 = vector.broadcast %27 : vector<1x32x16xf32> to vector<4x32x16xf32>
    %29 = arith.subf %23, %28 : vector<4x32x16xf32>
    %30 = arith.mulf %29, %29 : vector<4x32x16xf32>
    %cst_16 = arith.constant dense<0.000000e+00> : vector<32x16xf32>
    %31 = vector.multi_reduction <add>, %30, %cst_16 [0] : vector<4x32x16xf32> to vector<32x16xf32>
    %cst_17 = arith.constant 2.500000e-01 : f32
    %32 = vector.broadcast %cst_17 : f32 to vector<32x16xf32>
    %33 = arith.mulf %31, %32 : vector<32x16xf32>
    %34 = vector.extract_strided_slice %17 {offsets = [0, 0], sizes = [32, 16], strides = [1, 1]} : vector<32x64xf32> to vector<32x16xf32>
    %cst_18 = arith.constant 9.99999974E-6 : f32
    %35 = vector.broadcast %cst_18 : f32 to vector<32x16xf32>
    %36 = arith.addf %33, %35 : vector<32x16xf32>
    %37 = math.rsqrt %36 : vector<32x16xf32>
    %38 = arith.mulf %34, %37 : vector<32x16xf32>
    %39 = vector.shape_cast %38 : vector<32x16xf32> to vector<1x32x16xf32>
    %40 = vector.broadcast %21 : vector<4x32x1xf32> to vector<4x32x16xf32>
    %41 = vector.broadcast %39 : vector<1x32x16xf32> to vector<4x32x16xf32>
    %42 = arith.mulf %40, %41 : vector<4x32x16xf32>
    %43 = arith.addf %19, %42 : vector<4x32x16xf32>
    %44 = arith.mulf %26, %38 : vector<32x16xf32>
    %45 = vector.extract_strided_slice %18 {offsets = [0, 0], sizes = [32, 16], strides = [1, 1]} : vector<32x64xf32> to vector<32x16xf32>
    %46 = arith.subf %44, %45 : vector<32x16xf32>
    %47 = arith.addf %20, %46 : vector<32x16xf32>
    %48 = vector.extract_strided_slice %16 {offsets = [0, 0, 1], sizes = [4, 32, 1], strides = [1, 1, 1]} : vector<4x32x4xf32> to vector<4x32x1xf32>
    %49 = vector.broadcast %48 : vector<4x32x1xf32> to vector<4x32x16xf32>
    %50 = arith.mulf %49, %0 : vector<4x32x16xf32>
    %cst_19 = arith.constant dense<0.000000e+00> : vector<32x16xf32>
    %51 = vector.multi_reduction <add>, %50, %cst_19 [0] : vector<4x32x16xf32> to vector<32x16xf32>
    %cst_20 = arith.constant 2.500000e-01 : f32
    %52 = vector.broadcast %cst_20 : f32 to vector<32x16xf32>
    %53 = arith.mulf %51, %52 : vector<32x16xf32>
    %54 = vector.shape_cast %53 : vector<32x16xf32> to vector<1x32x16xf32>
    %55 = vector.broadcast %54 : vector<1x32x16xf32> to vector<4x32x16xf32>
    %56 = arith.subf %50, %55 : vector<4x32x16xf32>
    %57 = arith.mulf %56, %56 : vector<4x32x16xf32>
    %cst_21 = arith.constant dense<0.000000e+00> : vector<32x16xf32>
    %58 = vector.multi_reduction <add>, %57, %cst_21 [0] : vector<4x32x16xf32> to vector<32x16xf32>
    %cst_22 = arith.constant 2.500000e-01 : f32
    %59 = vector.broadcast %cst_22 : f32 to vector<32x16xf32>
    %60 = arith.mulf %58, %59 : vector<32x16xf32>
    %61 = vector.extract_strided_slice %17 {offsets = [0, 16], sizes = [32, 16], strides = [1, 1]} : vector<32x64xf32> to vector<32x16xf32>
    %cst_23 = arith.constant 9.99999974E-6 : f32
    %62 = vector.broadcast %cst_23 : f32 to vector<32x16xf32>
    %63 = arith.addf %60, %62 : vector<32x16xf32>
    %64 = math.rsqrt %63 : vector<32x16xf32>
    %65 = arith.mulf %61, %64 : vector<32x16xf32>
    %66 = vector.shape_cast %65 : vector<32x16xf32> to vector<1x32x16xf32>
    %67 = vector.broadcast %48 : vector<4x32x1xf32> to vector<4x32x16xf32>
    %68 = vector.broadcast %66 : vector<1x32x16xf32> to vector<4x32x16xf32>
    %69 = arith.mulf %67, %68 : vector<4x32x16xf32>
    %70 = arith.addf %43, %69 : vector<4x32x16xf32>
    %71 = arith.mulf %53, %65 : vector<32x16xf32>
    %72 = vector.extract_strided_slice %18 {offsets = [0, 16], sizes = [32, 16], strides = [1, 1]} : vector<32x64xf32> to vector<32x16xf32>
    %73 = arith.subf %71, %72 : vector<32x16xf32>
    %74 = arith.addf %47, %73 : vector<32x16xf32>
    %75 = vector.extract_strided_slice %16 {offsets = [0, 0, 2], sizes = [4, 32, 1], strides = [1, 1, 1]} : vector<4x32x4xf32> to vector<4x32x1xf32>
    %76 = vector.broadcast %75 : vector<4x32x1xf32> to vector<4x32x16xf32>
    %77 = arith.mulf %76, %0 : vector<4x32x16xf32>
    %cst_24 = arith.constant dense<0.000000e+00> : vector<32x16xf32>
    %78 = vector.multi_reduction <add>, %77, %cst_24 [0] : vector<4x32x16xf32> to vector<32x16xf32>
    %cst_25 = arith.constant 2.500000e-01 : f32
    %79 = vector.broadcast %cst_25 : f32 to vector<32x16xf32>
    %80 = arith.mulf %78, %79 : vector<32x16xf32>
    %81 = vector.shape_cast %80 : vector<32x16xf32> to vector<1x32x16xf32>
    %82 = vector.broadcast %81 : vector<1x32x16xf32> to vector<4x32x16xf32>
    %83 = arith.subf %77, %82 : vector<4x32x16xf32>
    %84 = arith.mulf %83, %83 : vector<4x32x16xf32>
    %cst_26 = arith.constant dense<0.000000e+00> : vector<32x16xf32>
    %85 = vector.multi_reduction <add>, %84, %cst_26 [0] : vector<4x32x16xf32> to vector<32x16xf32>
    %cst_27 = arith.constant 2.500000e-01 : f32
    %86 = vector.broadcast %cst_27 : f32 to vector<32x16xf32>
    %87 = arith.mulf %85, %86 : vector<32x16xf32>
    %88 = vector.extract_strided_slice %17 {offsets = [0, 32], sizes = [32, 16], strides = [1, 1]} : vector<32x64xf32> to vector<32x16xf32>
    %cst_28 = arith.constant 9.99999974E-6 : f32
    %89 = vector.broadcast %cst_28 : f32 to vector<32x16xf32>
    %90 = arith.addf %87, %89 : vector<32x16xf32>
    %91 = math.rsqrt %90 : vector<32x16xf32>
    %92 = arith.mulf %88, %91 : vector<32x16xf32>
    %93 = vector.shape_cast %92 : vector<32x16xf32> to vector<1x32x16xf32>
    %94 = vector.broadcast %75 : vector<4x32x1xf32> to vector<4x32x16xf32>
    %95 = vector.broadcast %93 : vector<1x32x16xf32> to vector<4x32x16xf32>
    %96 = arith.mulf %94, %95 : vector<4x32x16xf32>
    %97 = arith.addf %70, %96 : vector<4x32x16xf32>
    %98 = arith.mulf %80, %92 : vector<32x16xf32>
    %99 = vector.extract_strided_slice %18 {offsets = [0, 32], sizes = [32, 16], strides = [1, 1]} : vector<32x64xf32> to vector<32x16xf32>
    %100 = arith.subf %98, %99 : vector<32x16xf32>
    %101 = arith.addf %74, %100 : vector<32x16xf32>
    %102 = vector.extract_strided_slice %16 {offsets = [0, 0, 3], sizes = [4, 32, 1], strides = [1, 1, 1]} : vector<4x32x4xf32> to vector<4x32x1xf32>
    %103 = vector.broadcast %102 : vector<4x32x1xf32> to vector<4x32x16xf32>
    %104 = arith.mulf %103, %0 : vector<4x32x16xf32>
    %cst_29 = arith.constant dense<0.000000e+00> : vector<32x16xf32>
    %105 = vector.multi_reduction <add>, %104, %cst_29 [0] : vector<4x32x16xf32> to vector<32x16xf32>
    %cst_30 = arith.constant 2.500000e-01 : f32
    %106 = vector.broadcast %cst_30 : f32 to vector<32x16xf32>
    %107 = arith.mulf %105, %106 : vector<32x16xf32>
    %108 = vector.shape_cast %107 : vector<32x16xf32> to vector<1x32x16xf32>
    %109 = vector.broadcast %108 : vector<1x32x16xf32> to vector<4x32x16xf32>
    %110 = arith.subf %104, %109 : vector<4x32x16xf32>
    %111 = arith.mulf %110, %110 : vector<4x32x16xf32>
    %cst_31 = arith.constant dense<0.000000e+00> : vector<32x16xf32>
    %112 = vector.multi_reduction <add>, %111, %cst_31 [0] : vector<4x32x16xf32> to vector<32x16xf32>
    %cst_32 = arith.constant 2.500000e-01 : f32
    %113 = vector.broadcast %cst_32 : f32 to vector<32x16xf32>
    %114 = arith.mulf %112, %113 : vector<32x16xf32>
    %115 = vector.extract_strided_slice %17 {offsets = [0, 48], sizes = [32, 16], strides = [1, 1]} : vector<32x64xf32> to vector<32x16xf32>
    %cst_33 = arith.constant 9.99999974E-6 : f32
    %116 = vector.broadcast %cst_33 : f32 to vector<32x16xf32>
    %117 = arith.addf %114, %116 : vector<32x16xf32>
    %118 = math.rsqrt %117 : vector<32x16xf32>
    %119 = arith.mulf %115, %118 : vector<32x16xf32>
    %120 = vector.shape_cast %119 : vector<32x16xf32> to vector<1x32x16xf32>
    %121 = vector.broadcast %102 : vector<4x32x1xf32> to vector<4x32x16xf32>
    %122 = vector.broadcast %120 : vector<1x32x16xf32> to vector<4x32x16xf32>
    %123 = arith.mulf %121, %122 : vector<4x32x16xf32>
    %124 = arith.addf %97, %123 : vector<4x32x16xf32>
    %125 = arith.mulf %107, %119 : vector<32x16xf32>
    %126 = vector.extract_strided_slice %18 {offsets = [0, 48], sizes = [32, 16], strides = [1, 1]} : vector<32x64xf32> to vector<32x16xf32>
    %127 = arith.subf %125, %126 : vector<32x16xf32>
    %128 = arith.addf %101, %127 : vector<32x16xf32>
    %129 = arith.mulf %0, %124 : vector<4x32x16xf32>
    %130 = vector.shape_cast %128 : vector<32x16xf32> to vector<1x32x16xf32>
    %131 = vector.broadcast %130 : vector<1x32x16xf32> to vector<4x32x16xf32>
    %132 = arith.subf %129, %131 : vector<4x32x16xf32>
    %cst_34 = arith.constant 5.000000e-01 : f32
    %133 = vector.broadcast %cst_34 : f32 to vector<4x32x16xf32>
    %134 = arith.mulf %132, %133 : vector<4x32x16xf32>
    %135 = arith.addf %0, %134 : vector<4x32x16xf32>
    %c0_35 = arith.constant 0 : index
    %c0_36 = arith.constant 0 : index
    %c0_37 = arith.constant 0 : index
    %136 = vector.load %arg6[%c0_35, %c0_36, %c0_37] : memref<4x32x16xf32, #tpu.memory_space<vmem>>, vector<4x32x16xf32>
    tpu.vector_store %arg6[%c0_35, %c0_36, %c0_37], %135 {strides = array<i32>} : memref<4x32x16xf32, #tpu.memory_space<vmem>>, vector<4x32x16xf32>,
    return
  }
  func.func @transform_0(%arg0: i32) -> (i32, i32, i32) {
    %c0_i32 = arith.constant 0 : i32
    %c0_i32_0 = arith.constant 0 : i32
    %c0_i32_1 = arith.constant 0 : i32
    return %c0_i32, %arg0, %c0_i32_0 : i32, i32, i32
  }
  func.func @transform_1(%arg0: i32) -> (i32, i32) {
    %c0_i32 = arith.constant 0 : i32
    %c0_i32_0 = arith.constant 0 : i32
    %c0_i32_1 = arith.constant 0 : i32
    return %c0_i32, %c0_i32_0 : i32, i32
  }
  func.func @transform_2(%arg0: i32) -> (i32, i32) {
    %c0_i32 = arith.constant 0 : i32
    %c0_i32_0 = arith.constant 0 : i32
    %c0_i32_1 = arith.constant 0 : i32
    return %c0_i32, %c0_i32_0 : i32, i32
  }
  func.func @transform_3(%arg0: i32) -> (i32, i32) {
    %c0_i32 = arith.constant 0 : i32
    %c0_i32_0 = arith.constant 0 : i32
    return %arg0, %c0_i32 : i32, i32
  }
  func.func @transform_4(%arg0: i32) -> (i32, i32) {
    %c0_i32 = arith.constant 0 : i32
    %c0_i32_0 = arith.constant 0 : i32
    return %arg0, %c0_i32 : i32, i32
  }
  func.func @transform_5(%arg0: i32) -> (i32, i32, i32) {
    %c0_i32 = arith.constant 0 : i32
    %c0_i32_0 = arith.constant 0 : i32
    %c0_i32_1 = arith.constant 0 : i32
    return %c0_i32, %arg0, %c0_i32_0 : i32, i32, i32
  }
}

</mosaic_0001>

<bundles_post_ra>
// kernel: tpu_custom_call.1
= control target key start
LH: loop header
LB: loop body
LE: loop exit
PB: predicated region body
PF: predicated region fallthrough
CT: control target
= control target key end

     0   :  { %vm45_vm0 = vcmask 130048   ;;  %s2035_s20 = smov 112   ;;  %vm239_vm1 = vcmask 31744   ;;  %s2041_s13 = smov 80   ;;  %s3648_s1 = inlined_call_operand.vmem [shape: f32[16,4], index: 1, kind: input, shape index: {}]   ;;  %s3649_s0 = inlined_call_operand.vmem [shape: f32[4,32,16], index: 0, kind: input, shape index: {}]   ;;  %s3650_s4 = inlined_call_operand.vmem [shape: f32[32,64], index: 4, kind: input, shape index: {}]   ;;  %s3651_s2 = inlined_call_operand.vmem [shape: f32[1,4], index: 2, kind: input, shape index: {}]   ;;  %s3652_s3 = inlined_call_operand.vmem [shape: f32[32,64], index: 3, kind: input, shape index: {}]   ;;  %s3653_s5 = inlined_call_operand.vmem [shape: f32[4,32,16], index: 5, kind: output, shape index: {}]  }
   0x1   :  { %v36_v0 = vld [vmem:[%s3648_s1] sm:$0xff]  ;;  %v37_v1 = vld [vmem:[%s3648_s1 + $0x8] sm:$0xff]  ;;  %v22_v7 = vld [vmem:[%s3649_s0 + $0x10] sm:$0xff]  ;;  %s2042_s14 = smov 16   ;;  %s2043_s18 = smov 32  }
   0x2   :  { %v2084_v2 = vld [vmem:[%s3649_s0] sm:$0xff]  ;;  %v1843_v3 = vpack.c.bf16 %v37_v1, %v36_v0  ;;  %v2098_v5 = vld [vmem:[%s3649_s0 + $0x8] sm:$0xff]  ;;  %v30_v8 = vld [vmem:[%s3649_s0 + $0x50] sm:$0xff]  ;;  %s2044_s19 = smov 48  }
   0x3   :  { %1819 = vmatprep.mubr.msk.f32.mxu0 %vm45_vm0, %v2084_v2  ;;  %v2091_v4 = vld [vmem:[%s3649_s0 + $0x40] sm:$0xff]  ;;  %v2103_v6 = vld [vmem:[%s3649_s0 + $0x48] sm:$0xff]  ;;  %v23_v11 = vld [vmem:[%s3649_s0 + $0x18] sm:$0xff] }
   0x4   :  { %1831 = vmatprep.mubr.msk.f32.mxu1 %vm45_vm0, %v2091_v4  ;;  %1844 = vmatprep.subr.bf16.mxu0 %v1843_v3  ;;  %v2114_v9 = vld [vmem:[%s3650_s4 + $0x8] sm:$0xff]  ;;  %v2119_v10 = vld [vmem:[%s3650_s4] sm:$0xff]  ;;  %v31_v12 = vld [vmem:[%s3649_s0 + $0x58] sm:$0xff] }
   0x5   :  { %1847 = vmatprep.subr.bf16.mxu1 %v1843_v3  ;;  %1846 = vmatpush3.bf16.msra.mxu0 %v1843_v3  ;;  %v2136_v13 = vld [vmem:[%s3649_s0 + $0x20] sm:$0xff]  ;;  %v2150_v15 = vld [vmem:[%s3650_s4 + $0x18] sm:$0xff]  ;;  %v2155_v16 = vld [vmem:[%s3650_s4 + $0x10] sm:$0xff] }
   0x6   :  { %1848 = vmatpush3.bf16.msra.mxu1 %v1843_v3  ;;  %v2141_v14 = vld [vmem:[%s3649_s0 + $0x60] sm:$0xff]  ;;  %998 = vrot.lane.b32.xlu1 %v2114_v9, %s2035_s20  ;;  %v2164_v17 = vld [vmem:[%s3649_s0 + $0x28] sm:$0xff]  ;;  %v26_v19 = vld [vmem:[%s3649_s0 + $0x30] sm:$0xff] }
   0x7   :  { %996 = vrot.lane.b32.xlu0 %v2119_v10, %s2035_s20  ;;  %v2171_v18 = vld [vmem:[%s3649_s0 + $0x68] sm:$0xff]  ;;  %v34_v20 = vld [vmem:[%s3649_s0 + $0x70] sm:$0xff]  ;;  %v2191_v21 = vld [vmem:[%s3649_s0 + $0x38] sm:$0xff] }
   0x8   :  { %1820 = vmatmul.mubr.msk.f32.vlgmr.msra.gmra.mrb[0].mxu0 %vm45_vm0, %v2098_v5  ;;  %v35_v22 = vld [vmem:[%s3649_s0 + $0x78] sm:$0xff]  ;;  %v1780_v23 = vld [vmem:[%s3651_s2] ss:$0 sm:$0xff]  ;;  %s2040_s2 = smov 96  }
   0x9   :  { %1832 = vmatmul.mubr.msk.f32.vlgmr.msra.gmra.mrb[0].mxu1 %vm45_vm0, %v2103_v6  ;;  %1822 = vmatprep.mubr.msk.f32.mxu0 %vm45_vm0, %v22_v7 }
   0xa   :  { %1834 = vmatprep.mubr.msk.f32.mxu1 %vm45_vm0, %v30_v8  ;;  %1002 = vrot.lane.b32.xlu1 %v2150_v15, %s2035_s20 }
   0xb   :  { %1000 = vrot.lane.b32.xlu0 %v2155_v16, %s2035_s20 }
   0xc   :  { %1823 = vmatmul.mubr.msk.f32.gmra.mrb[2].mxu0 %vm45_vm0, %v23_v11 }
   0xd   :  { %1835 = vmatmul.mubr.msk.f32.gmra.mrb[2].mxu1 %vm45_vm0, %v31_v12  ;;  %1825 = vmatprep.mubr.msk.f32.mxu0 %vm45_vm0, %v2136_v13 }
   0xe   :  { %1837 = vmatprep.mubr.msk.f32.mxu1 %vm45_vm0, %v2141_v14 }
  0x10   :  { %1826 = vmatmul.mubr.msk.f32.gmra.mrb[4].mxu0 %vm45_vm0, %v2164_v17 }
  0x11   :  { %1838 = vmatmul.mubr.msk.f32.gmra.mrb[4].mxu1 %vm45_vm0, %v2171_v18  ;;  %1828 = vmatprep.mubr.msk.f32.mxu0 %vm45_vm0, %v26_v19 }
  0x12   :  { %1840 = vmatprep.mubr.msk.f32.mxu1 %vm45_vm0, %v34_v20 }
  0x14   :  { %1829 = vmatmul.mubr.msk.f32.gmra.mrb[6].mxu0 %vm45_vm0, %v2191_v21 }
  0x15   :  { %1841 = vmatmul.mubr.msk.f32.gmra.mrb[6].mxu1 %vm45_vm0, %v35_v22 }
  0x78   :  { %v2267_v20 = vpop.permute.xlu1 %998 }
  0x79   :  { %3713 = vst [vmem:[#allocation2_spill] sm:$0xff] %v2267_v20  ;;  %v2269_v22 = vpop.permute.xlu0 %996 }
  0x7a   :  { %3714 = vst [vmem:[#allocation3_spill] sm:$0xff] %v2269_v22 }
  0xdb   :  { %v1821_v24 = vpop.f32.mrb[0].mxu0 }
  0xdc   :  { %v1833_v25 = vpop.f32.mrb[0].mxu1  ;;  %v2203_v26 = vadd.f32 %v1821_v24, %v1780_v23  ;;  %v160_v28 = vpop.f32.mrb[1].mxu0 }
  0xdd   :  { %v2205_v27 = vadd.f32 %v1833_v25, %v1780_v23  ;;  %v200_v29 = vpop.f32.mrb[1].mxu1  ;;  %v2207_v30 = vadd.f32 %v1780_v23, %v160_v28  ;;  %v2273_v24 = vpop.permute.xlu0 %1000 }
  0xde   :  { %v243_v32 = vsel %vm239_vm1, %v2203_v26, -inf  ;;  %v2217_v39 = vadd.f32 %v1780_v23, %v200_v29  ;;  %3716 = vst [vmem:[#allocation5_spill] sm:$0xff] %v2273_v24 }
  0xdf   :  { %v267_v31 = vsel %vm239_vm1, %v2205_v27, -inf  ;;  %244 = vmax.xlane.f32.xlu0 %v243_v32  ;;  %v1824_v33 = vpop.f32.mrb[2].mxu0  ;;  %v240_v41 = vsel %vm239_vm1, %v2207_v30, -inf }
  0xe0   :  { %268 = vmax.xlane.f32.xlu1 %v267_v31  ;;  %v1836_v34 = vpop.f32.mrb[2].mxu1  ;;  %v2213_v35 = vadd.f32 %v1824_v33, %v1780_v23  ;;  %v170_v38 = vpop.f32.mrb[3].mxu0  ;;  %v264_v49 = vsel %vm239_vm1, %v2217_v39, -inf }
  0xe1   :  { %v2215_v36 = vadd.f32 %v1836_v34, %v1780_v23  ;;  %v210_v37 = vpop.f32.mrb[3].mxu1  ;;  %v2227_v46 = vadd.f32 %v1780_v23, %v170_v38 }
  0xe2   :  { %v249_v40 = vsel %vm239_vm1, %v2213_v35, -inf  ;;  %v2223_v44 = vadd.f32 %v1780_v23, %v210_v37 }
  0xe3   :  { %241 = vmax.xlane.f32.xlu0 %v240_v41  ;;  %v1827_v42 = vpop.f32.mrb[4].mxu0  ;;  %v273_v45 = vsel %vm239_vm1, %v2215_v36, -inf  ;;  %v246_v54 = vsel %vm239_vm1, %v2227_v46, -inf }
  0xe4   :  { %250 = vmax.xlane.f32.xlu1 %v249_v40  ;;  %v1839_v43 = vpop.f32.mrb[4].mxu1  ;;  %v180_v47 = vpop.f32.mrb[5].mxu0  ;;  %v2231_v52 = vadd.f32 %v1827_v42, %v1780_v23  ;;  %v270_v55 = vsel %vm239_vm1, %v2223_v44, -inf }
  0xe5   :  { %v220_v48 = vpop.f32.mrb[5].mxu1  ;;  %v2233_v53 = vadd.f32 %v1780_v23, %v180_v47  ;;  %v2239_v58 = vadd.f32 %v1839_v43, %v1780_v23 }
  0xe6   :  { %v2241_v59 = vadd.f32 %v1780_v23, %v220_v48  ;;  %v255_v60 = vsel %vm239_vm1, %v2231_v52, -inf }
  0xe7   :  { %265 = vmax.xlane.f32.xlu0 %v264_v49  ;;  %v1830_v50 = vpop.f32.mrb[6].mxu0  ;;  %v252_v61 = vsel %vm239_vm1, %v2233_v53, -inf  ;;  %v279_v0 = vsel %vm239_vm1, %v2239_v58, -inf }
  0xe8   :  { %274 = vmax.xlane.f32.xlu1 %v273_v45  ;;  %v1842_v51 = vpop.f32.mrb[6].mxu1  ;;  %v190_v56 = vpop.f32.mrb[7].mxu0  ;;  %v2247_v62 = vadd.f32 %v1830_v50, %v1780_v23  ;;  %v276_v1 = vsel %vm239_vm1, %v2241_v59, -inf }
  0xe9   :  { %v230_v57 = vpop.f32.mrb[7].mxu1  ;;  %v2249_v63 = vadd.f32 %v1780_v23, %v190_v56  ;;  %v2255_v3 = vadd.f32 %v1842_v51, %v1780_v23 }
  0xea   :  { %v2257_v7 = vadd.f32 %v1780_v23, %v230_v57  ;;  %v261_v8 = vsel %vm239_vm1, %v2247_v62, -inf  ;;  %v2271_v23 = vpop.permute.xlu1 %1002 }
  0xeb   :  { %271 = vmax.xlane.f32.xlu0 %v270_v55  ;;  %v258_v11 = vsel %vm239_vm1, %v2249_v63, -inf  ;;  %v285_v12 = vsel %vm239_vm1, %v2255_v3, -inf  ;;  %3715 = vst [vmem:[#allocation4_spill] sm:$0xff] %v2271_v23 }
  0xec   :  { %247 = vmax.xlane.f32.xlu1 %v246_v54  ;;  %v282_v19 = vsel %vm239_vm1, %v2257_v7, -inf }
  0xef   :  { %253 = vmax.xlane.f32.xlu0 %v252_v61 }
  0xf0   :  { %256 = vmax.xlane.f32.xlu1 %v255_v60 }
  0xf3   :  { %277 = vmax.xlane.f32.xlu0 %v276_v1 }
  0xf4   :  { %280 = vmax.xlane.f32.xlu1 %v279_v0 }
  0xf7   :  { %259 = vmax.xlane.f32.xlu0 %v258_v11 }
  0xf8   :  { %262 = vmax.xlane.f32.xlu1 %v261_v8 }
  0xfb   :  { %283 = vmax.xlane.f32.xlu0 %v282_v19 }
  0xfc   :  { %286 = vmax.xlane.f32.xlu1 %v285_v12 }
 0x16c   :  { %v245_v28 = vpop.xlane.xlu0 %244 }
 0x16d   :  { %v269_v25 = vpop.xlane.xlu1 %268  ;;  %v289_v31 = vsub.f32 %v2203_v26, %v245_v28 }
 0x16e   :  { %v297_v29 = vsub.f32 %v2205_v27, %v269_v25 }
 0x16f   :  { %v306_v33 = vmul.f32 1.442695, %v289_v31 }
 0x170   :  { %v322_v32 = vmul.f32 1.442695, %v297_v29  ;;  %v242_v37 = vpop.xlane.xlu0 %241 }
 0x171   :  { %v251_v34 = vpop.xlane.xlu1 %250  ;;  %v288_v40 = vsub.f32 %v2207_v30, %v242_v37  ;;  %1906 = vpow2.f32 %v306_v33 }
 0x172   :  { %v291_v38 = vsub.f32 %v2213_v35, %v251_v34  ;;  %1908 = vpow2.f32 %v322_v32 }
 0x173   :  { %v304_v42 = vmul.f32 1.442695, %v288_v40 }
 0x174   :  { %v310_v41 = vmul.f32 1.442695, %v291_v38  ;;  %v266_v45 = vpop.xlane.xlu0 %265 }
 0x175   :  { %v275_v43 = vpop.xlane.xlu1 %274  ;;  %v296_v27 = vsub.f32 %v2217_v39, %v266_v45  ;;  %1910 = vpow2.f32 %v304_v42 }
 0x176   :  { %v299_v47 = vsub.f32 %v2215_v36, %v275_v43  ;;  %1912 = vpow2.f32 %v310_v41 }
 0x177   :  { %v320_v26 = vmul.f32 1.442695, %v296_v27 }
 0x178   :  { %v326_v48 = vmul.f32 1.442695, %v299_v47  ;;  %v272_v50 = vpop.xlane.xlu0 %271 }
 0x179   :  { %v248_v49 = vpop.xlane.xlu1 %247  ;;  %v298_v30 = vsub.f32 %v2223_v44, %v272_v50  ;;  %1914 = vpow2.f32 %v320_v26 }
 0x17a   :  { %v290_v35 = vsub.f32 %v2227_v46, %v248_v49  ;;  %1916 = vpow2.f32 %v326_v48 }
 0x17b   :  { %v2283_v54 = vpop.eup %1906  ;;  %v324_v55 = vmul.f32 1.442695, %v298_v30 }
 0x17c   :  { %v308_v51 = vmul.f32 1.442695, %v290_v35  ;;  %v254_v36 = vpop.xlane.xlu0 %253  ;;  %v2285_v57 = vpop.eup %1908  ;;  %v339_v46 = vsel %vm239_vm1, %v2283_v54, 0.0 }
 0x17d   :  { %v257_v56 = vpop.xlane.xlu1 %256  ;;  %v292_v60 = vsub.f32 %v2233_v53, %v254_v36  ;;  %340 = vadd.xlane.f32.xlu1 %v339_v46  ;;  %v363_v11 = vsel %vm239_vm1, %v2285_v57, 0.0 }
 0x17e   :  { %1918 = vpow2.f32 %v308_v51  ;;  %v293_v39 = vsub.f32 %v2231_v52, %v257_v56 }
 0x17f   :  { %v2291_v61 = vpop.eup %1910  ;;  %1920 = vpow2.f32 %v324_v55  ;;  %v312_v0 = vmul.f32 1.442695, %v292_v60 }
 0x180   :  { %v314_v44 = vmul.f32 1.442695, %v293_v39  ;;  %v278_v8 = vpop.xlane.xlu0 %277  ;;  %v2295_v12 = vpop.eup %1912  ;;  %v336_v19 = vsel %vm239_vm1, %v2291_v61, 0.0 }
 0x181   :  { %v281_v1 = vpop.xlane.xlu1 %280  ;;  %v300_v53 = vsub.f32 %v2241_v59, %v278_v8  ;;  %364 = vadd.xlane.f32.xlu1 %v363_v11  ;;  %337 = vadd.xlane.f32.xlu0 %v336_v19  ;;  %v345_v33 = vsel %vm239_vm1, %v2295_v12, 0.0 }
 0x182   :  { %1922 = vpow2.f32 %v314_v44  ;;  %v301_v52 = vsub.f32 %v2239_v58, %v281_v1  ;;  %v2036_v1 = vmov 0  }
 0x183   :  { %v2301_v28 = vpop.eup %1914  ;;  %1924 = vpow2.f32 %v312_v0  ;;  %v328_v29 = vmul.f32 1.442695, %v300_v53  ;;  %1859 = vset.pattern.permute.xlu1 %v2036_v1  ;;  %1860 = vset.pattern.permute.xlu0 %v2036_v1 }
 0x184   :  { %v330_v25 = vmul.f32 1.442695, %v301_v52  ;;  %v260_v32 = vpop.xlane.xlu0 %259  ;;  %v360_v34 = vsel %vm239_vm1, %v2301_v28, 0.0  ;;  %v2309_v37 = vpop.eup %1916 }
 0x185   :  { %v263_v31 = vpop.xlane.xlu1 %262  ;;  %v294_v59 = vsub.f32 %v2249_v63, %v260_v32  ;;  %346 = vadd.xlane.f32.xlu1 %v345_v33  ;;  %361 = vadd.xlane.f32.xlu0 %v360_v34  ;;  %v369_v47 = vsel %vm239_vm1, %v2309_v37, 0.0 }
 0x186   :  { %1926 = vpow2.f32 %v330_v25  ;;  %v295_v58 = vsub.f32 %v2247_v62, %v263_v31 }
 0x187   :  { %1928 = vpow2.f32 %v328_v29  ;;  %v316_v41 = vmul.f32 1.442695, %v294_v59  ;;  %v2038_v59 = vmov 2  }
 0x188   :  { %v2311_v38 = vpop.eup %1918  ;;  %v318_v40 = vmul.f32 1.442695, %v295_v58  ;;  %v284_v43 = vpop.xlane.xlu0 %283  ;;  %v2037_v58 = vmov 1  }
 0x189   :  { %v287_v42 = vpop.xlane.xlu1 %286  ;;  %v342_v45 = vsel %vm239_vm1, %v2311_v38, 0.0  ;;  %v302_v63 = vsub.f32 %v2257_v7, %v284_v43  ;;  %v2319_v27 = vpop.eup %1920  ;;  %370 = vadd.xlane.f32.xlu1 %v369_v47 }
 0x18a   :  { %1930 = vpow2.f32 %v318_v40  ;;  %v303_v62 = vsub.f32 %v2255_v3, %v287_v42  ;;  %343 = vadd.xlane.f32.xlu0 %v342_v45  ;;  %v366_v3 = vsel %vm239_vm1, %v2319_v27, 0.0  ;;  %v2039_v40 = vmov 3  }
 0x18b   :  { %1932 = vpow2.f32 %v316_v41  ;;  %v332_v49 = vmul.f32 1.442695, %v302_v63 }
 0x18c   :  { %v2321_v26 = vpop.eup %1922  ;;  %v334_v48 = vmul.f32 1.442695, %v303_v62 }
 0x18d   :  { %v351_v50 = vsel %vm239_vm1, %v2321_v26, 0.0  ;;  %v2327_v7 = vpop.eup %1924 }
 0x18e   :  { %1934 = vpow2.f32 %v334_v48  ;;  %352 = vadd.xlane.f32.xlu1 %v351_v50  ;;  %367 = vadd.xlane.f32.xlu0 %v366_v3  ;;  %v348_v51 = vsel %vm239_vm1, %v2327_v7, 0.0 }
 0x18f   :  { %1936 = vpow2.f32 %v332_v49 }
 0x190   :  { %v2329_v35 = vpop.eup %1926 }
 0x191   :  { %v375_v30 = vsel %vm239_vm1, %v2329_v35, 0.0  ;;  %v2335_v55 = vpop.eup %1928 }
 0x192   :  { %376 = vadd.xlane.f32.xlu1 %v375_v30  ;;  %349 = vadd.xlane.f32.xlu0 %v348_v51  ;;  %v372_v39 = vsel %vm239_vm1, %v2335_v55, 0.0 }
 0x194   :  { %v2337_v56 = vpop.eup %1930 }
 0x195   :  { %v357_v36 = vsel %vm239_vm1, %v2337_v56, 0.0  ;;  %v2343_v60 = vpop.eup %1932 }
 0x196   :  { %358 = vadd.xlane.f32.xlu1 %v357_v36  ;;  %373 = vadd.xlane.f32.xlu0 %v372_v39  ;;  %v354_v0 = vsel %vm239_vm1, %v2343_v60, 0.0 }
 0x198   :  { %v2345_v46 = vpop.eup %1934 }
 0x199   :  { %v381_v44 = vsel %vm239_vm1, %v2345_v46, 0.0  ;;  %v2353_v8 = vpop.eup %1936 }
 0x19a   :  { %382 = vadd.xlane.f32.xlu1 %v381_v44  ;;  %355 = vadd.xlane.f32.xlu0 %v354_v0  ;;  %v378_v11 = vsel %vm239_vm1, %v2353_v8, 0.0 }
 0x19e   :  { %379 = vadd.xlane.f32.xlu0 %v378_v11 }
 0x20a   :  { %v341_v52 = vpop.xlane.xlu1 %340 }
 0x20b   :  { %1938 = vrcp.f32 %v341_v52 }
 0x20e   :  { %v365_v53 = vpop.xlane.xlu1 %364  ;;  %v338_v19 = vpop.xlane.xlu0 %337 }
 0x20f   :  { %1940 = vrcp.f32 %v365_v53 }
 0x212   :  { %v362_v29 = vpop.xlane.xlu0 %361  ;;  %v347_v42 = vpop.xlane.xlu1 %346 }
 0x213   :  { %1942 = vrcp.f32 %v362_v29 }
 0x214   :  { %1944 = vrcp.f32 %v338_v19 }
 0x215   :  { %v1939_v25 = vpop.eup %1938  ;;  %1946 = vrcp.f32 %v347_v42 }
 0x216   :  { %v387_v31 = vmul.f32 %v1939_v25, %v2283_v54 }
 0x218   :  { %431 = vperm.xlu1 %1859, %v387_v31  }
 0x219   :  { %v1941_v32 = vpop.eup %1940 }
 0x21a   :  { %v403_v33 = vmul.f32 %v1941_v32, %v2285_v57 }
 0x21c   :  { %1862 = vset.pattern.permute.xlu1 %v2037_v58  ;;  %471 = vperm.xlu0 %1860, %v403_v33  }
 0x21d   :  { %709 = vperm.xlu1 %1862, %v403_v33   ;;  %v1943_v34 = vpop.eup %1942 }
 0x21e   :  { %v401_v54 = vmul.f32 %v1943_v34, %v2301_v28  ;;  %v1945_v57 = vpop.eup %1944  ;;  %v371_v28 = vpop.xlane.xlu1 %370 }
 0x21f   :  { %v385_v41 = vmul.f32 %v1945_v57, %v2291_v61  ;;  %1948 = vrcp.f32 %v371_v28  ;;  %v344_v61 = vpop.xlane.xlu0 %343  ;;  %v1947_v43 = vpop.eup %1946 }
 0x220   :  { %1861 = vset.pattern.permute.xlu0 %v2037_v58  ;;  %v391_v45 = vmul.f32 %v1947_v43, %v2295_v12 }
 0x221   :  { %1863 = vset.pattern.permute.xlu1 %v2038_v59  ;;  %677 = vperm.xlu0 %1861, %v387_v31  }
 0x222   :  { %1021 = vperm.xlu1 %1863, %v387_v31   ;;  %v353_v63 = vpop.xlane.xlu1 %352 }
 0x223   :  { %v368_v47 = vpop.xlane.xlu0 %367 }
 0x224   :  { %1950 = vrcp.f32 %v368_v47 }
 0x225   :  { %1864 = vset.pattern.permute.xlu0 %v2038_v59  ;;  %1952 = vrcp.f32 %v344_v61 }
 0x226   :  { %1867 = vset.pattern.permute.xlu1 %v2036_v1  ;;  %1053 = vperm.xlu0 %1864, %v403_v33   ;;  %v377_v49 = vpop.xlane.xlu1 %376 }
 0x227   :  { %466 = vperm.xlu1 %1867, %v401_v54   ;;  %1954 = vrcp.f32 %v377_v49  ;;  %v350_v50 = vpop.xlane.xlu0 %349 }
 0x228   :  { %1956 = vrcp.f32 %v353_v63 }
 0x229   :  { %v1949_v62 = vpop.eup %1948  ;;  %1958 = vrcp.f32 %v350_v50 }
 0x22a   :  { %1865 = vset.pattern.permute.xlu0 %v2039_v40  ;;  %v407_v48 = vmul.f32 %v1949_v62, %v2309_v37  ;;  %v359_v11 = vpop.xlane.xlu1 %358 }
 0x22b   :  { %1361 = vperm.xlu0 %1865, %v387_v31   ;;  %1868 = vset.pattern.permute.xlu1 %v2037_v58  ;;  %v374_v51 = vpop.xlane.xlu0 %373 }
 0x22c   :  { %673 = vperm.xlu1 %1868, %v385_v41   ;;  %1960 = vrcp.f32 %v374_v51 }
 0x22e   :  { %v1951_v12 = vpop.eup %1950 }
 0x22f   :  { %1393 = vperm.xlu0 %1865, %v403_v33   ;;  %v405_v37 = vmul.f32 %v1951_v12, %v2319_v27  ;;  %v1953_v3 = vpop.eup %1952 }
 0x230   :  { %1871 = vset.pattern.permute.xlu1 %v2038_v59  ;;  %v389_v36 = vmul.f32 %v1953_v3, %v2311_v38 }
 0x231   :  { %1049 = vperm.xlu1 %1871, %v401_v54   ;;  %v1955_v30 = vpop.eup %1954 }
 0x232   :  { %v2384_v39 = vmul.f32 %v1955_v30, %v2329_v35  ;;  %v1957_v44 = vpop.eup %1956 }
 0x233   :  { %1866 = vset.pattern.permute.xlu0 %v2036_v1  ;;  %v395_v27 = vmul.f32 %v1957_v44, %v2321_v26  ;;  %v1959_v0 = vpop.eup %1958  ;;  %v383_v26 = vpop.xlane.xlu1 %382 }
 0x234   :  { %426 = vperm.xlu0 %1866, %v385_v41   ;;  %v2393_v38 = vmul.f32 %v1959_v0, %v2327_v7  ;;  %1962 = vrcp.f32 %v383_v26  ;;  %v356_v7 = vpop.xlane.xlu0 %355 }
 0x235   :  { %1872 = vset.pattern.permute.xlu1 %v2039_v40  ;;  %1964 = vrcp.f32 %v359_v11 }
 0x236   :  { %1357 = vperm.xlu1 %1872, %v385_v41   ;;  %v1961_v35 = vpop.eup %1960  ;;  %1966 = vrcp.f32 %v356_v7 }
 0x237   :  { %v409_v52 = vmul.f32 %v1961_v35, %v2335_v55 }
 0x238   :  { %1869 = vset.pattern.permute.xlu0 %v2037_v58  ;;  %v380_v25 = vpop.xlane.xlu0 %379 }
 0x239   :  { %705 = vperm.xlu0 %1869, %v401_v54   ;;  %1968 = vrcp.f32 %v380_v25 }
 0x23a   :  { %1389 = vperm.xlu1 %1872, %v401_v54  }
 0x23d   :  { %1870 = vset.pattern.permute.xlu0 %v2038_v59 }
 0x23e   :  { %1017 = vperm.xlu0 %1870, %v385_v41   ;;  %1873 = vset.pattern.permute.xlu1 %v2036_v1  ;;  %v1963_v55 = vpop.eup %1962 }
 0x23f   :  { %441 = vperm.xlu1 %1873, %v391_v45   ;;  %v2406_v53 = vmul.f32 %v1963_v55, %v2345_v46  ;;  %v1965_v19 = vpop.eup %1964 }
 0x240   :  { %v399_v29 = vmul.f32 %v1965_v19, %v2337_v56  ;;  %v1967_v46 = vpop.eup %1966 }
 0x241   :  { %v397_v31 = vmul.f32 %v1967_v46, %v2343_v60 }
 0x242   :  { %1874 = vset.pattern.permute.xlu0 %v2036_v1 }
 0x243   :  { %481 = vperm.xlu0 %1874, %v407_v48   ;;  %1875 = vset.pattern.permute.xlu1 %v2037_v58  ;;  %v1969_v32 = vpop.eup %1968 }
 0x244   :  { %685 = vperm.xlu1 %1875, %v391_v45   ;;  %v413_v56 = vmul.f32 %v1969_v32, %v2353_v8 }
 0x247   :  { %1876 = vset.pattern.permute.xlu0 %v2038_v59 }
 0x248   :  { %1029 = vperm.xlu0 %1876, %v391_v45   ;;  %717 = vperm.xlu1 %1875, %v407_v48  }
 0x24c   :  { %1061 = vperm.xlu0 %1876, %v407_v48   ;;  %1877 = vset.pattern.permute.xlu1 %v2039_v40 }
 0x24d   :  { %1369 = vperm.xlu1 %1877, %v391_v45  }
 0x250   :  { %1880 = vset.pattern.permute.xlu0 %v2037_v58 }
 0x251   :  { %1401 = vperm.xlu1 %1877, %v407_v48   ;;  %713 = vperm.xlu0 %1880, %v405_v37  }
 0x255   :  { %1878 = vset.pattern.permute.xlu1 %v2036_v1  ;;  %1884 = vset.pattern.permute.xlu0 %v2036_v1 }
 0x256   :  { %436 = vperm.xlu1 %1878, %v389_v36   ;;  %491 = vperm.xlu0 %1884, %v2384_v39  }
 0x25a   :  { %1886 = vset.pattern.permute.xlu0 %v2038_v59  ;;  %476 = vperm.xlu1 %1878, %v405_v37  }
 0x25b   :  { %1037 = vperm.xlu0 %1886, %v395_v27  }
 0x25e   :  { %1879 = vset.pattern.permute.xlu1 %v2037_v58 }
 0x25f   :  { %1891 = vset.pattern.permute.xlu0 %v2037_v58  ;;  %681 = vperm.xlu1 %1879, %v389_v36  }
 0x260   :  { %689 = vperm.xlu0 %1891, %v2393_v38  }
 0x263   :  { %1881 = vset.pattern.permute.xlu1 %v2038_v59 }
 0x264   :  { %1025 = vperm.xlu1 %1881, %v389_v36   ;;  %721 = vperm.xlu0 %1891, %v409_v52  }
 0x268   :  { %1057 = vperm.xlu1 %1881, %v405_v37   ;;  %1893 = vset.pattern.permute.xlu0 %v2039_v40 }
 0x269   :  { %1373 = vperm.xlu0 %1893, %v2393_v38  }
 0x26c   :  { %1882 = vset.pattern.permute.xlu1 %v2039_v40 }
 0x26d   :  { %1365 = vperm.xlu1 %1882, %v389_v36   ;;  %1894 = vset.pattern.permute.xlu0 %v2038_v59 }
 0x26e   :  { %1065 = vperm.xlu0 %1894, %v409_v52  }
 0x271   :  { %1397 = vperm.xlu1 %1882, %v405_v37  }
 0x272   :  { %1895 = vset.pattern.permute.xlu0 %v2039_v40 }
 0x273   :  { %1405 = vperm.xlu0 %1895, %v409_v52  }
 0x275   :  { %1883 = vset.pattern.permute.xlu1 %v2036_v1 }
 0x276   :  { %451 = vperm.xlu1 %1883, %v395_v27  }
 0x277   :  { %1897 = vset.pattern.permute.xlu0 %v2036_v1 }
 0x278   :  { %501 = vperm.xlu0 %1897, %v2406_v53  }
 0x27a   :  { %1885 = vset.pattern.permute.xlu1 %v2037_v58 }
 0x27b   :  { %693 = vperm.xlu1 %1885, %v395_v27  }
 0x27c   :  { %1899 = vset.pattern.permute.xlu0 %v2038_v59 }
 0x27d   :  { %1045 = vperm.xlu0 %1899, %v399_v29  }
 0x27f   :  { %725 = vperm.xlu1 %1885, %v2384_v39  }
 0x281   :  { %1077 = vperm.xlu0 %1899, %v2406_v53  }
 0x283   :  { %1887 = vset.pattern.permute.xlu1 %v2039_v40 }
 0x284   :  { %1377 = vperm.xlu1 %1887, %v395_v27  }
 0x285   :  { %1902 = vset.pattern.permute.xlu0 %v2037_v58 }
 0x286   :  { %697 = vperm.xlu0 %1902, %v397_v31  }
 0x288   :  { %1888 = vset.pattern.permute.xlu1 %v2038_v59 }
 0x289   :  { %1069 = vperm.xlu1 %1888, %v2384_v39  }
 0x28a   :  { %729 = vperm.xlu0 %1902, %v413_v56  }
 0x28d   :  { %1889 = vset.pattern.permute.xlu1 %v2039_v40 }
 0x28e   :  { %1409 = vperm.xlu1 %1889, %v2384_v39   ;;  %1904 = vset.pattern.permute.xlu0 %v2039_v40 }
 0x28f   :  { %1381 = vperm.xlu0 %1904, %v397_v31  }
 0x292   :  { %1890 = vset.pattern.permute.xlu1 %v2036_v1 }
 0x293   :  { %446 = vperm.xlu1 %1890, %v2393_v38   ;;  %1336 = vrot.lane.b32.xlu0 %v2119_v10, %s2040_s2 }
 0x297   :  { %v2428_v60 = vpop.permute.xlu1 %431  ;;  %486 = vperm.xlu1 %1890, %v409_v52   ;;  %1413 = vperm.xlu0 %1904, %v413_v56  }
 0x298   :  { %3717 = vst [vmem:[#allocation6_spill] sm:$0xff] %v2428_v60 }
 0x29b   :  { %1892 = vset.pattern.permute.xlu1 %v2038_v59  ;;  %v2431_v8 = vpop.permute.xlu0 %471  ;;  %1340 = vrot.lane.b32.xlu0 %v2155_v16, %s2040_s2 }
 0x29c   :  { %3718 = vst [vmem:[#allocation7_spill] sm:$0xff] %v2431_v8  ;;  %v2435_v33 = vpop.permute.xlu1 %709  ;;  %1033 = vperm.xlu1 %1892, %v2393_v38  }
 0x29f   :  { %1676 = vrot.lane.b32.xlu0 %v2119_v10, %s2041_s13 }
 0x2a0   :  { %1896 = vset.pattern.permute.xlu1 %v2036_v1  ;;  %v2441_v34 = vpop.permute.xlu0 %677 }
 0x2a1   :  { %v2443_v54 = vpop.permute.xlu1 %1021  ;;  %461 = vperm.xlu1 %1896, %v399_v29  }
 0x2a2   :  { %3719 = vst [vmem:[#allocation8_spill] sm:$0xff] %v2443_v54 }
 0x2a5   :  { %1898 = vset.pattern.permute.xlu1 %v2037_v58  ;;  %v2446_v57 = vpop.permute.xlu0 %1053 }
 0x2a6   :  { %3720 = vst [vmem:[#allocation9_spill] sm:$0xff] %v2446_v57  ;;  %v2448_v16 = vpop.permute.xlu1 %466  ;;  %701 = vperm.xlu1 %1898, %v399_v29  }
 0x2a7   :  { %3721 = vst [vmem:[#allocation10_spill] sm:$0xff] %v2448_v16 }
 0x2aa   :  { %733 = vperm.xlu1 %1898, %v2406_v53   ;;  %v2451_v41 = vpop.permute.xlu0 %1361 }
 0x2ab   :  { %3722 = vst [vmem:[#allocation11_spill] sm:$0xff] %v2451_v41  ;;  %v2453_v42 = vpop.permute.xlu1 %673  ;;  %v2601_v20 = vmul.f32 %v2451_v41, %v2098_v5  ;;  %v2725_v41 = vld [vmem:[%s3649_s0 + $0x78] sm:$0xff] }
 0x2ac   :  { %3723 = vst [vmem:[#allocation12_spill] sm:$0xff] %v2453_v42  ;;  %v736_v36 = vmul.f32 %v2453_v42, %v2084_v2 }
 0x2ae   :  { %1900 = vset.pattern.permute.xlu1 %v2039_v40  ;;  %v2456_v10 = vpop.permute.xlu0 %1393  ;;  %v752_v27 = vsel %vm45_vm0, %v736_v36, 0.0 }
 0x2af   :  { %3724 = vst [vmem:[#allocation13_spill] sm:$0xff] %v2456_v10  ;;  %1385 = vperm.xlu1 %1900, %v399_v29  }
 0x2b0   :  { %v2458_v28 = vpop.permute.xlu1 %1049 }
 0x2b1   :  { %3725 = vst [vmem:[#allocation14_spill] sm:$0xff] %v2458_v28 }
 0x2b3   :  { %1901 = vset.pattern.permute.xlu1 %v2036_v1  ;;  %v2461_v58 = vpop.permute.xlu0 %426 }
 0x2b4   :  { %3726 = vst [vmem:[#allocation15_spill] sm:$0xff] %v2461_v58  ;;  %456 = vperm.xlu1 %1901, %v397_v31  }
 0x2b5   :  { %v2463_v61 = vpop.permute.xlu1 %1357 }
 0x2b6   :  { %3727 = vst [vmem:[#allocation16_spill] sm:$0xff] %v2463_v61 }
 0x2b8   :  { %496 = vperm.xlu1 %1901, %v413_v56   ;;  %v2465_v43 = vpop.permute.xlu0 %705 }
 0x2b9   :  { %3728 = vst [vmem:[#allocation17_spill] sm:$0xff] %v2465_v43  ;;  %v2467_v45 = vpop.permute.xlu1 %1389  ;;  %v744_v44 = vmul.f32 %v2465_v43, %v2091_v4 }
 0x2ba   :  { %3729 = vst [vmem:[#allocation18_spill] sm:$0xff] %v2467_v45 }
 0x2bb   :  { %v755_v52 = vsel %vm45_vm0, %v744_v44, 0.0 }
 0x2bc   :  { %1903 = vset.pattern.permute.xlu1 %v2038_v59 }
 0x2bd   :  { %1041 = vperm.xlu1 %1903, %v397_v31   ;;  %v2470_v62 = vpop.permute.xlu0 %1017 }
 0x2be   :  { %3730 = vst [vmem:[#allocation19_spill] sm:$0xff] %v2470_v62  ;;  %v2472_v63 = vpop.permute.xlu1 %441 }
 0x2bf   :  { %3731 = vst [vmem:[#allocation20_spill] sm:$0xff] %v2472_v63 }
 0x2c1   :  { %1073 = vperm.xlu1 %1903, %v413_v56  }
 0x2c2   :  { %v2474_v47 = vpop.permute.xlu0 %481 }
 0x2c3   :  { %3732 = vst [vmem:[#allocation21_spill] sm:$0xff] %v2474_v47  ;;  %v2476_v1 = vpop.permute.xlu1 %685 }
 0x2c4   :  { %3733 = vst [vmem:[#allocation22_spill] sm:$0xff] %v2476_v1 }
 0x2c5   :  { %1905 = vset.pattern.permute.xlu1 %v2039_v40 }
 0x2c6   :  { %1417 = vperm.xlu1 %1905, %v2406_v53  }
 0x2c7   :  { %v2480_v48 = vpop.permute.xlu1 %717  ;;  %v2482_v49 = vpop.permute.xlu0 %1029 }
 0x2c8   :  { %3734 = vst [vmem:[#allocation23_spill] sm:$0xff] %v2480_v48  ;;  %3735 = vst [vmem:[#allocation24_spill] sm:$0xff] %v2482_v49 }
 0x2ca   :  { %1338 = vrot.lane.b32.xlu1 %v2114_v9, %s2040_s2 }
 0x2cb   :  { %v2486_v59 = vpop.permute.xlu0 %1061 }
 0x2cc   :  { %3736 = vst [vmem:[#allocation25_spill] sm:$0xff] %v2486_v59  ;;  %v2488_v12 = vpop.permute.xlu1 %1369 }
 0x2cd   :  { %3737 = vst [vmem:[#allocation26_spill] sm:$0xff] %v2488_v12 }
 0x2ce   :  { %1342 = vrot.lane.b32.xlu1 %v2150_v15, %s2040_s2 }
 0x2d0   :  { %v2492_v50 = vpop.permute.xlu1 %1401  ;;  %v2494_v37 = vpop.permute.xlu0 %713 }
 0x2d1   :  { %3738 = vst [vmem:[#allocation27_spill] sm:$0xff] %v2494_v37 }
 0x2d2   :  { %1678 = vrot.lane.b32.xlu1 %v2114_v9, %s2041_s13 }
 0x2d5   :  { %v2498_v40 = vpop.permute.xlu1 %436  ;;  %v2500_v3 = vpop.permute.xlu0 %491 }
 0x2d6   :  { %3739 = vst [vmem:[#allocation28_spill] sm:$0xff] %v2498_v40  ;;  %3740 = vst [vmem:[#allocation29_spill] sm:$0xff] %v2500_v3 }
 0x2d9   :  { %v2502_v30 = vpop.permute.xlu1 %476 }
 0x2da   :  { %3741 = vst [vmem:[#allocation30_spill] sm:$0xff] %v2502_v30  ;;  %v2504_v51 = vpop.permute.xlu0 %1037 }
 0x2db   :  { %3742 = vst [vmem:[#allocation31_spill] sm:$0xff] %v2504_v51 }
 0x2de   :  { %v2508_v39 = vpop.permute.xlu1 %681 }
 0x2df   :  { %3743 = vst [vmem:[#allocation32_spill] sm:$0xff] %v2508_v39  ;;  %v2510_v15 = vpop.permute.xlu0 %689 }
 0x2e0   :  { %3744 = vst [vmem:[#allocation33_spill] sm:$0xff] %v2510_v15  ;;  %v740_v9 = vmul.f32 %v2510_v15, %v2136_v13 }
 0x2e2   :  { %v753_v0 = vsel %vm45_vm0, %v740_v9, 0.0 }
 0x2e3   :  { %v754_v38 = vadd.f32 %v753_v0, %v752_v27  ;;  %v2518_v35 = vpop.permute.xlu1 %1025  ;;  %v2520_v11 = vpop.permute.xlu0 %721 }
 0x2e4   :  { %3745 = vst [vmem:[#allocation34_spill] sm:$0xff] %v2520_v11  ;;  %v748_v26 = vmul.f32 %v2520_v11, %v2141_v14  ;;  %v2707_v11 = vld [vmem:[%s3649_s0 + $0x68] sm:$0xff] }
 0x2e5   :  { %v756_v7 = vadd.f32 %v755_v52, %v754_v38  ;;  %3760 = vst [vmem:[#allocation49_spill] sm:$0xff] %v2707_v11 }
 0x2e6   :  { %v757_v4 = vsel %vm45_vm0, %v748_v26, 0.0 }
 0x2e7   :  { %v758_v55 = vadd.f32 %v757_v4, %v756_v7  ;;  %v2526_v53 = vpop.permute.xlu1 %1057 }
 0x2e8   :  { %v2530_v25 = vpop.permute.xlu0 %1373 }
 0x2e9   :  { %v2528_v19 = vmul.f32 0.25, %v758_v55  ;;  %3747 = vst [vmem:[#allocation36_spill] sm:$0xff] %v2530_v25 }
 0x2eb   :  { %3746 = vst [vmem:[#allocation35_spill] sm:$0xff] %v2528_v19  ;;  %v784_v29 = vsub.f32 %v736_v36, %v2528_v19  ;;  %v788_v46 = vsub.f32 %v740_v9, %v2528_v19  ;;  %v792_v31 = vsub.f32 %v744_v44, %v2528_v19  ;;  %v796_v32 = vsub.f32 %v748_v26, %v2528_v19 }
 0x2ec   :  { %v2536_v56 = vpop.permute.xlu1 %1365  ;;  %v2575_v19 = vmul.f32 %v2443_v54, %v2098_v5 }
 0x2ed   :  { %3748 = vst [vmem:[#allocation37_spill] sm:$0xff] %v2536_v56  ;;  %v800_v27 = vmul.f32 %v784_v29, %v784_v29  ;;  %v804_v0 = vmul.f32 %v788_v46, %v788_v46  ;;  %v808_v38 = vmul.f32 %v792_v31, %v792_v31  ;;  %v812_v52 = vmul.f32 %v796_v32, %v796_v32  ;;  %v2540_v55 = vpop.permute.xlu0 %1065 }
 0x2ee   :  { %v737_v32 = vmul.f32 %v2441_v34, %v2098_v5  ;;  %v1103_v63 = vsel %vm45_vm0, %v2575_v19, 0.0 }
 0x2ef   :  { %v816_v7 = vsel %vm45_vm0, %v800_v27, 0.0  ;;  %v817_v4 = vsel %vm45_vm0, %v804_v0, 0.0  ;;  %v819_v9 = vsel %vm45_vm0, %v808_v38, 0.0  ;;  %v821_v26 = vsel %vm45_vm0, %v812_v52, 0.0 }
 0x2f0   :  { %v818_v24 = vadd.f32 %v817_v4, %v816_v7  ;;  %v2542_v36 = vpop.permute.xlu1 %1397  ;;  %v745_v0 = vmul.f32 %v2435_v33, %v2103_v6  ;;  %v759_v52 = vsel %vm45_vm0, %v737_v32, 0.0 }
 0x2f2   :  { %v820_v44 = vadd.f32 %v819_v9, %v818_v24  ;;  %v2546_v22 = vpop.permute.xlu0 %1405  ;;  %v762_v9 = vsel %vm45_vm0, %v745_v0, 0.0 }
 0x2f3   :  { %3749 = vst [vmem:[#allocation38_spill] sm:$0xff] %v2546_v22  ;;  %v2619_v5 = vmul.f32 %v2546_v22, %v2141_v14 }
 0x2f4   :  { %v822_v23 = vadd.f32 %v821_v26, %v820_v44 }
 0x2f5   :  { %v2548_v29 = vpop.permute.xlu1 %451 }
 0x2f6   :  { %3750 = vst [vmem:[#allocation39_spill] sm:$0xff] %v2548_v29  ;;  %v844_v46 = vmul.f32 0.25, %v822_v23 }
 0x2f7   :  { %v2556_v38 = vpop.permute.xlu0 %501 }
 0x2f8   :  { %v848_v31 = vadd.f32 1e-05, %v844_v46  ;;  %3751 = vst [vmem:[#allocation40_spill] sm:$0xff] %v2556_v38  ;;  %v2569_v46 = vmul.f32 %v2530_v25, %v2136_v13  ;;  %v2590_v38 = vmul.f32 %v2504_v51, %v2164_v17 }
 0x2fa   :  { %1970 = vrsqrt.f32 %v848_v31  ;;  %v2552_v27 = vpop.permute.xlu1 %693  ;;  %v1437_v47 = vsel %vm45_vm0, %v2569_v46, 0.0 }
 0x2fb   :  { %v741_v24 = vmul.f32 %v2552_v27, %v2164_v17 }
 0x2fc   :  { %v2571_v31 = vpop.permute.xlu0 %1045 }
 0x2fd   :  { %v760_v7 = vsel %vm45_vm0, %v741_v24, 0.0  ;;  %3752 = vst [vmem:[#allocation41_spill] sm:$0xff] %v2571_v31 }
 0x2fe   :  { %v761_v23 = vadd.f32 %v760_v7, %v759_v52  ;;  %v2562_v4 = vpop.permute.xlu1 %725  ;;  %v2579_v52 = vmul.f32 %v2446_v57, %v2103_v6 }
 0x2ff   :  { %v749_v44 = vmul.f32 %v2562_v4, %v2171_v18  ;;  %v2584_v18 = vmul.f32 %v2463_v61, %v2084_v2 }
 0x300   :  { %v763_v26 = vadd.f32 %v762_v9, %v761_v23  ;;  %v1106_v2 = vsel %vm45_vm0, %v2579_v52, 0.0 }
 0x301   :  { %v764_v7 = vsel %vm45_vm0, %v749_v44, 0.0  ;;  %v1436_v16 = vsel %vm45_vm0, %v2584_v18, 0.0 }
 0x302   :  { %v765_v9 = vadd.f32 %v764_v7, %v763_v26  ;;  %v2607_v7 = vmul.f32 %v2456_v10, %v2103_v6  ;;  %v1438_v3 = vadd.f32 %v1437_v47, %v1436_v16  ;;  %v2640_v16 = vmul.f32 %v2571_v31, %v2191_v21 }
 0x303   :  { %v2586_v23 = vpop.permute.xlu1 %1377  ;;  %v1441_v21 = vsel %vm45_vm0, %v2619_v5, 0.0 }
 0x304   :  { %3753 = vst [vmem:[#allocation42_spill] sm:$0xff] %v2586_v23  ;;  %v1971_v13 = vpop.eup %1970  ;;  %v2603_v26 = vmul.f32 0.25, %v765_v9  ;;  %v2621_v9 = vpop.permute.xlu0 %1077  ;;  %v2636_v22 = vmul.f32 %v2586_v23, %v2164_v17  ;;  %v1446_v31 = vsel %vm45_vm0, %v2607_v7, 0.0 }
 0x305   :  { %860 = vrot.lane.b32.xlu0 %v1971_v13, %s2042_s14  ;;  %v2002_v13 = vld [vmem:[%s3649_s0 + $0x40] sm:$0xff]  ;;  %3755 = vst [vmem:[#allocation44_spill] sm:$0xff] %v2621_v9  ;;  %v2729_v43 = vmul.f32 %v2725_v41, %v2621_v9 }
 0x306   :  { %3754 = vst [vmem:[#allocation43_spill] sm:$0xff] %v2603_v26  ;;  %v2615_v58 = vmul.f32 %v2002_v13, %v2467_v45  ;;  %v785_v6 = vsub.f32 %v737_v32, %v2603_v26  ;;  %v789_v8 = vsub.f32 %v741_v24, %v2603_v26  ;;  %v793_v60 = vsub.f32 %v745_v0, %v2603_v26 }
 0x307   :  { %v2629_v25 = vmul.f32 %v2002_v13, %v2458_v28  ;;  %v1104_v45 = vsel %vm45_vm0, %v2590_v38, 0.0  ;;  %v797_v14 = vsub.f32 %v749_v44, %v2603_v26  ;;  %v1443_v24 = vsel %vm45_vm0, %v2601_v20, 0.0  ;;  %v2649_v44 = vld [vmem:[%s3649_s0 + $0x18] sm:$0xff] }
 0x308   :  { %v2626_v29 = vpop.permute.xlu1 %1069  ;;  %v801_v47 = vmul.f32 %v785_v6, %v785_v6  ;;  %v805_v32 = vmul.f32 %v789_v8, %v789_v8  ;;  %v809_v0 = vmul.f32 %v793_v60, %v793_v60  ;;  %v1439_v13 = vsel %vm45_vm0, %v2615_v58, 0.0  ;;  %v2663_v23 = vpop.permute.xlu0 %697 }
 0x309   :  { %3756 = vst [vmem:[#allocation45_spill] sm:$0xff] %v2626_v29  ;;  %v2653_v17 = vmul.f32 %v2649_v44, %v2482_v49  ;;  %v1440_v8 = vadd.f32 %v1439_v13, %v1438_v3  ;;  %v813_v60 = vmul.f32 %v797_v14, %v797_v14  ;;  %v1105_v61 = vadd.f32 %v1104_v45, %v1103_v63  ;;  %v2677_v45 = vld [vmem:[%s3649_s0] sm:$0xff]  ;;  %v2688_v13 = vld [vmem:[%s3649_s0 + $0x58] sm:$0xff] }
 0x30a   :  { %v823_v6 = vsel %vm45_vm0, %v801_v47, 0.0  ;;  %v824_v26 = vsel %vm45_vm0, %v805_v32, 0.0  ;;  %v1444_v10 = vsel %vm45_vm0, %v2636_v22, 0.0  ;;  %3757 = vst [vmem:[#allocation46_spill] sm:$0xff] %v2663_v23  ;;  %v2669_v3 = vsel %vm45_vm0, %v2629_v25, 0.0  ;;  %3759 = vst [vmem:[#allocation48_spill] sm:$0xff] %v2677_v45 }
 0x30b   :  { %v825_v28 = vadd.f32 %v824_v26, %v823_v6  ;;  %v1442_v14 = vadd.f32 %v1441_v21, %v1440_v8  ;;  %v1118_v47 = vsel %vm45_vm0, %v2640_v16, 0.0  ;;  %v826_v32 = vsel %vm45_vm0, %v809_v0, 0.0 }
 0x30c   :  { %v2681_v63 = vmul.f32 %v2677_v45, %v2470_v62  ;;  %v1117_v26 = vsel %vm45_vm0, %v2653_v17, 0.0  ;;  %v2692_v0 = vmul.f32 %v2688_v13, %v2486_v59  ;;  %v828_v8 = vsel %vm45_vm0, %v813_v60, 0.0  ;;  %v2698_v45 = vld [vmem:[%s3649_s0 + $0x30] sm:$0xff] }
 0x30d   :  { %v2665_v49 = vpop.permute.xlu1 %1409  ;;  %v827_v21 = vadd.f32 %v826_v32, %v825_v28  ;;  %v1445_v6 = vadd.f32 %v1444_v10, %v1443_v24  ;;  %v2702_v62 = vmul.f32 %v2698_v45, %v2663_v23  ;;  %v1093_v28 = vmul.f32 %v2707_v11, %v2626_v29  ;;  %v2714_v10 = vld [vmem:[%s3649_s0 + $0x10] sm:$0xff] }
 0x30e   :  { %3758 = vst [vmem:[#allocation47_spill] sm:$0xff] %v2665_v49  ;;  %v2718_v24 = vmul.f32 %v2714_v10, %v2508_v39  ;;  %v1119_v60 = vadd.f32 %v1118_v47, %v1117_v26  ;;  %v1107_v23 = vadd.f32 %v1106_v2, %v1105_v61  ;;  %v2720_v59 = vmul.f32 0.25, %v1442_v14 }
 0x30f   :  { %v829_v32 = vadd.f32 %v828_v8, %v827_v21  ;;  %v1108_v29 = vsel %vm45_vm0, %v1093_v28, 0.0  ;;  %v1433_v39 = vmul.f32 %v2707_v11, %v2665_v49  ;;  %v2738_v61 = vmul.f32 %v2649_v44, %v2476_v1 }
 0x310   :  { %3761 = vst [vmem:[#allocation50_spill] sm:$0xff] %v2720_v59  ;;  %v2742_v2 = vmul.f32 %v2688_v13, %v2480_v48  ;;  %v1109_v47 = vadd.f32 %v1108_v29, %v1107_v23  ;;  %v1120_v26 = vsel %vm45_vm0, %v2692_v0, 0.0  ;;  %v767_v21 = vsel %vm45_vm0, %v2702_v62, 0.0  ;;  %v2760_v48 = vpop.permute.xlu0 %729 }
 0x311   :  { %v845_v14 = vmul.f32 0.25, %v829_v32  ;;  %v1447_v8 = vadd.f32 %v1446_v31, %v1445_v6  ;;  %v1448_v9 = vsel %vm45_vm0, %v1433_v39, 0.0  ;;  %v1121_v29 = vadd.f32 %v1120_v26, %v1119_v60  ;;  %3764 = vst [vmem:[#allocation53_spill] sm:$0xff] %v2760_v48 }
 0x312   :  { %v2734_v15 = vpop.permute.xlu1 %446  ;;  %v2758_v23 = vmul.f32 0.25, %v1109_v47  ;;  %v766_v31 = vsel %vm45_vm0, %v2718_v24, 0.0  ;;  %v1468_v6 = vsub.f32 %v2584_v18, %v2720_v59  ;;  %v1122_v1 = vsel %vm45_vm0, %v2729_v43, 0.0 }
 0x313   :  { %3762 = vst [vmem:[#allocation51_spill] sm:$0xff] %v2734_v15  ;;  %v2752_v15 = vld [vmem:[%s3649_s0 + $0x50] sm:$0xff]  ;;  %v849_v32 = vadd.f32 1e-05, %v845_v14  ;;  %v1449_v49 = vadd.f32 %v1448_v9, %v1447_v8  ;;  %v1472_v47 = vsub.f32 %v2569_v46, %v2720_v59  ;;  %v2792_v46 = vsel %vm45_vm0, %v2681_v63, 0.0 }
 0x314   :  { %v2756_v11 = vmul.f32 %v2752_v15, %v2494_v37  ;;  %3763 = vst [vmem:[#allocation52_spill] sm:$0xff] %v2758_v23  ;;  %v768_v37 = vadd.f32 %v767_v21, %v766_v31  ;;  %v1129_v60 = vsub.f32 %v2575_v19, %v2758_v23  ;;  %v1133_v14 = vsub.f32 %v2590_v38, %v2758_v23  ;;  %v2782_v9 = vld [vmem:[%s3649_s0 + $0x70] sm:$0xff] }
 0x315   :  { %1972 = vrsqrt.f32 %v849_v32  ;;  %v1137_v18 = vsub.f32 %v2579_v52, %v2758_v23  ;;  %v1141_v26 = vsub.f32 %v1093_v28, %v2758_v23  ;;  %v2786_v21 = vmul.f32 %v2782_v9, %v2760_v48 }
 0x316   :  { %v2768_v57 = vpop.permute.xlu1 %486  ;;  %v1123_v19 = vadd.f32 %v1122_v1, %v1121_v29  ;;  %v1145_v8 = vmul.f32 %v1129_v60, %v1129_v60  ;;  %v1149_v38 = vmul.f32 %v1133_v14, %v1133_v14  ;;  %v2788_v32 = vmul.f32 0.25, %v1449_v49 }
 0x317   :  { %3765 = vst [vmem:[#allocation54_spill] sm:$0xff] %v2768_v57  ;;  %v2796_v52 = vsel %vm45_vm0, %v2738_v61, 0.0  ;;  %v769_v28 = vsel %vm45_vm0, %v2756_v11, 0.0  ;;  %v1153_v31 = vmul.f32 %v1137_v18, %v1137_v18  ;;  %v1157_v23 = vmul.f32 %v1141_v26, %v1141_v26 }
 0x318   :  { %3766 = vst [vmem:[#allocation55_spill] sm:$0xff] %v2788_v32  ;;  %v1167_v57 = vsel %vm45_vm0, %v1145_v8, 0.0  ;;  %v1168_v1 = vsel %vm45_vm0, %v1149_v38, 0.0  ;;  %v770_v29 = vadd.f32 %v769_v28, %v768_v37  ;;  %v1484_v60 = vmul.f32 %v1468_v6, %v1468_v6  ;;  %v2823_v8 = vpop.permute.xlu0 %1381 }
 0x319   :  { %v1488_v14 = vmul.f32 %v1472_v47, %v1472_v47  ;;  %v1169_v48 = vadd.f32 %v1168_v1, %v1167_v57  ;;  %v771_v42 = vsel %vm45_vm0, %v2786_v21, 0.0  ;;  %v2808_v51 = vsel %vm45_vm0, %v2742_v2, 0.0  ;;  %3768 = vst [vmem:[#allocation57_spill] sm:$0xff] %v2823_v8 }
 0x31a   :  { %v2810_v54 = vmul.f32 0.25, %v1123_v19  ;;  %v1170_v18 = vsel %vm45_vm0, %v1153_v31, 0.0  ;;  %v1469_v26 = vsub.f32 %v2601_v20, %v2788_v32  ;;  %v2817_v37 = vmul.f32 %v2649_v44, %v2488_v12 }
 0x31b   :  { %v2802_v49 = vpop.permute.xlu1 %1033  ;;  %v1171_v6 = vadd.f32 %v1170_v18, %v1169_v48  ;;  %v1473_v57 = vsub.f32 %v2636_v22, %v2788_v32  ;;  %v1477_v47 = vsub.f32 %v2607_v7, %v2788_v32  ;;  %v1476_v19 = vsub.f32 %v2615_v58, %v2720_v59 }
 0x31c   :  { %3767 = vst [vmem:[#allocation56_spill] sm:$0xff] %v2810_v54  ;;  %v1172_v38 = vsel %vm45_vm0, %v1157_v23, 0.0  ;;  %v772_v28 = vadd.f32 %v771_v42, %v770_v29  ;;  %v1481_v20 = vsub.f32 %v1433_v39, %v2788_v32  ;;  %v1500_v44 = vsel %vm45_vm0, %v1484_v60, 0.0  ;;  %v2852_v32 = vpop.permute.xlu0 %1336 }
 0x31d   :  { %v1501_v48 = vsel %vm45_vm0, %v1488_v14, 0.0  ;;  %v1173_v31 = vadd.f32 %v1172_v38, %v1171_v6  ;;  %v1485_v1 = vmul.f32 %v1469_v26, %v1469_v26  ;;  %v1131_v7 = vsub.f32 %v2653_v17, %v2810_v54  ;;  %3771 = vst [vmem:[#allocation60_spill] sm:$0xff] %v2852_v32 }
 0x31e   :  { %v1135_v58 = vsub.f32 %v2640_v16, %v2810_v54  ;;  %v1489_v12 = vmul.f32 %v1473_v57, %v1473_v57  ;;  %v1493_v23 = vmul.f32 %v1477_v47, %v1477_v47  ;;  %v2839_v42 = vsel %vm45_vm0, %v2817_v37, 0.0 }
 0x31f   :  { %v1973_v18 = vpop.eup %1972  ;;  %v2843_v39 = vmul.f32 %v2714_v10, %v2536_v56  ;;  %v1189_v29 = vmul.f32 0.25, %v1173_v31  ;;  %v1507_v60 = vsel %vm45_vm0, %v1485_v1, 0.0  ;;  %v1480_v17 = vsub.f32 %v2619_v5, %v2720_v59 }
 0x320   :  { %v2831_v22 = vpop.permute.xlu1 %461  ;;  %862 = vrot.lane.b32.xlu1 %v1973_v18, %s2042_s14  ;;  %v2849_v14 = vmul.f32 0.25, %v772_v28  ;;  %v1497_v16 = vmul.f32 %v1481_v20, %v1481_v20  ;;  %v1508_v26 = vsel %vm45_vm0, %v1489_v12, 0.0  ;;  %v1492_v6 = vmul.f32 %v1476_v19, %v1476_v19  ;;  %v2858_v18 = vld [vmem:[%s3649_s0 + $0x20] sm:$0xff]  ;;  %v2896_v56 = vpop.permute.xlu0 %1413 }
 0x321   :  { %3769 = vst [vmem:[#allocation58_spill] sm:$0xff] %v2831_v22  ;;  %v1502_v57 = vadd.f32 %v1501_v48, %v1500_v44  ;;  %v1193_v47 = vadd.f32 1e-05, %v1189_v29  ;;  %v1509_v38 = vadd.f32 %v1508_v26, %v1507_v60  ;;  %v1147_v22 = vmul.f32 %v1131_v7, %v1131_v7 }
 0x322   :  { %3770 = vst [vmem:[#allocation59_spill] sm:$0xff] %v2849_v14  ;;  %v1151_v31 = vmul.f32 %v1135_v58, %v1135_v58  ;;  %v1510_v1 = vsel %vm45_vm0, %v1493_v23, 0.0  ;;  %v2862_v5 = vmul.f32 %v2858_v18, %v2802_v49  ;;  %v1139_v19 = vsub.f32 %v2692_v0, %v2810_v54  ;;  %v2884_v23 = vld [vmem:[%s3649_s0 + $0x60] sm:$0xff] }
 0x323   :  { %1974 = vrsqrt.f32 %v1193_v47  ;;  %v1511_v28 = vadd.f32 %v1510_v1, %v1509_v38  ;;  %v2870_v20 = vmul.f32 %v2698_v45, %v2823_v8  ;;  %v786_v44 = vsub.f32 %v2718_v24, %v2849_v14 }
 0x324   :  { %v790_v48 = vsub.f32 %v2702_v62, %v2849_v14  ;;  %v1512_v7 = vsel %vm45_vm0, %v1497_v16, 0.0  ;;  %v1097_v58 = vsel %vm45_vm0, %v2862_v5, 0.0  ;;  %v1450_v0 = vsel %vm45_vm0, %v2843_v39, 0.0 }
 0x325   :  { %v2864_v12 = vpop.permute.xlu1 %701  ;;  %v1092_v29 = vmul.f32 %v2884_v23, %v2540_v55  ;;  %v1513_v24 = vadd.f32 %v1512_v7, %v1511_v28  ;;  %v1098_v60 = vadd.f32 %v1097_v58, %v2792_v46  ;;  %v1496_v62 = vmul.f32 %v1480_v17, %v1480_v17 }
 0x326   :  { %v1503_v16 = vsel %vm45_vm0, %v1492_v6, 0.0  ;;  %v1181_v26 = vsel %vm45_vm0, %v1147_v22, 0.0  ;;  %v1182_v47 = vsel %vm45_vm0, %v1151_v31, 0.0  ;;  %v1143_v32 = vsub.f32 %v2729_v43, %v2810_v54 }
 0x327   :  { %v1504_v1 = vadd.f32 %v1503_v16, %v1502_v57  ;;  %v1155_v59 = vmul.f32 %v1139_v19, %v1139_v19  ;;  %v1529_v8 = vmul.f32 0.25, %v1513_v24  ;;  %v802_v28 = vmul.f32 %v786_v44, %v786_v44 }
 0x328   :  { %v806_v7 = vmul.f32 %v790_v48, %v790_v48  ;;  %v1451_v46 = vsel %vm45_vm0, %v2870_v20, 0.0  ;;  %v1100_v17 = vadd.f32 %v2669_v3, %v1098_v60  ;;  %v1101_v22 = vsel %vm45_vm0, %v1092_v29, 0.0  ;;  %v2916_v3 = vld [vmem:[%s3649_s0 + $0x38] sm:$0xff] }
 0x329   :  { %v2892_v38 = vpop.permute.xlu1 %733  ;;  %v2904_v6 = vmul.f32 %v2752_v15, %v2542_v36  ;;  %v1183_v57 = vadd.f32 %v1182_v47, %v1181_v26  ;;  %v1533_v31 = vadd.f32 1e-05, %v1529_v8  ;;  %v1505_v43 = vsel %vm45_vm0, %v1496_v62, 0.0  ;;  %3772 = vst [vmem:[#allocation61_spill] sm:$0xff] %v2916_v3 }
 0x32a   :  { %v794_v19 = vsub.f32 %v2756_v11, %v2849_v14  ;;  %v2911_v44 = vmul.f32 %v2782_v9, %v2896_v56  ;;  %v2920_v48 = vmul.f32 %v2916_v3, %v2864_v12  ;;  %v1506_v58 = vadd.f32 %v1505_v43, %v1504_v1 }
 0x32b   :  { %v1159_v8 = vmul.f32 %v1143_v32, %v1143_v32  ;;  %1976 = vrsqrt.f32 %v1533_v31  ;;  %v1452_v24 = vadd.f32 %v1451_v46, %v1450_v0  ;;  %v1184_v11 = vsel %vm45_vm0, %v1155_v59, 0.0 }
 0x32c   :  { %v830_v62 = vsel %vm45_vm0, %v802_v28, 0.0  ;;  %v831_v16 = vsel %vm45_vm0, %v806_v7, 0.0  ;;  %v1102_v26 = vadd.f32 %v1101_v22, %v1100_v17  ;;  %v2929_v54 = vmul.f32 %v2688_v13, %v2492_v50 }
 0x32d   :  { %v1975_v47 = vpop.eup %1974  ;;  %v1453_v1 = vsel %vm45_vm0, %v2904_v6, 0.0  ;;  %v1185_v32 = vadd.f32 %v1184_v11, %v1183_v57  ;;  %v798_v0 = vsub.f32 %v2786_v21, %v2849_v14  ;;  %v810_v46 = vmul.f32 %v794_v19, %v794_v19 }
 0x32e   :  { %v2922_v60 = vpop.permute.xlu1 %1385  ;;  %v1455_v59 = vsel %vm45_vm0, %v2911_v44, 0.0  ;;  %v2937_v28 = vmul.f32 0.25, %v1102_v26  ;;  %v774_v7 = vsel %vm45_vm0, %v2920_v48, 0.0  ;;  %1206 = vrot.lane.b32.xlu1 %v1975_v47, %s2043_s18  ;;  %v1528_v13 = vmul.f32 0.25, %v1506_v58 }
 0x32f   :  { %v1186_v17 = vsel %vm45_vm0, %v1159_v8, 0.0  ;;  %v832_v22 = vadd.f32 %v831_v16, %v830_v62  ;;  %v1454_v57 = vadd.f32 %v1453_v1, %v1452_v24  ;;  %v814_v47 = vmul.f32 %v798_v0, %v798_v0 }
 0x330   :  { %3773 = vst [vmem:[#allocation62_spill] sm:$0xff] %v2937_v28  ;;  %v1128_v21 = vsub.f32 %v2681_v63, %v2937_v28  ;;  %v1132_v31 = vsub.f32 %v2862_v5, %v2937_v28  ;;  %v1136_v43 = vsub.f32 %v2629_v25, %v2937_v28  ;;  %v1140_v19 = vsub.f32 %v1092_v29, %v2937_v28 }
 0x331   :  { %v1187_v26 = vadd.f32 %v1186_v17, %v1185_v32  ;;  %v1456_v58 = vadd.f32 %v1455_v59, %v1454_v57  ;;  %v775_v8 = vadd.f32 %v774_v7, %v2796_v52  ;;  %v833_v24 = vsel %vm45_vm0, %v810_v46, 0.0 }
 0x332   :  { %v1144_v62 = vmul.f32 %v1128_v21, %v1128_v21  ;;  %v1148_v16 = vmul.f32 %v1132_v31, %v1132_v31  ;;  %v1152_v63 = vmul.f32 %v1136_v43, %v1136_v43  ;;  %v2956_v5 = vmul.f32 %v2714_v10, %v2498_v40 }
 0x333   :  { %v2950_v11 = vpop.permute.xlu1 %456  ;;  %v2960_v25 = vmul.f32 %v2752_v15, %v2502_v30  ;;  %v2964_v29 = vmul.f32 %v2714_v10, %v2518_v35  ;;  %v834_v1 = vadd.f32 %v833_v24, %v832_v22  ;;  %v2968_v52 = vmul.f32 %v2752_v15, %v2526_v53 }
 0x334   :  { %v1156_v32 = vmul.f32 %v1140_v19, %v1140_v19  ;;  %v1160_v0 = vsel %vm45_vm0, %v1144_v62, 0.0  ;;  %v1161_v46 = vsel %vm45_vm0, %v1148_v16, 0.0  ;;  %v1532_v17 = vadd.f32 1e-05, %v1528_v13 }
 0x335   :  { %v1977_v7 = vpop.eup %1976  ;;  %v2974_v57 = vmul.f32 0.25, %v1456_v58  ;;  %v1162_v21 = vadd.f32 %v1161_v46, %v1160_v0  ;;  %v777_v10 = vadd.f32 %v2808_v51, %v775_v8  ;;  %v1191_v31 = vmul.f32 0.25, %v1187_v26 }
 0x336   :  { %v835_v22 = vsel %vm45_vm0, %v814_v47, 0.0  ;;  %v1163_v15 = vsel %vm45_vm0, %v1152_v63, 0.0  ;;  %v751_v43 = vmul.f32 %v2725_v41, %v2892_v38  ;;  %1546 = vrot.lane.b32.xlu1 %v1977_v7, %s2044_s19  ;;  %v2984_v19 = vsel %vm45_vm0, %v2929_v54, 0.0 }
 0x337   :  { %v2972_v59 = vpop.permute.xlu1 %496  ;;  %3774 = vst [vmem:[#allocation63_spill] sm:$0xff] %v2974_v57  ;;  %v534_v13 = vsel %vm45_vm0, %v2956_v5, 0.0  ;;  %v836_v58 = vadd.f32 %v835_v22, %v834_v1  ;;  %v1164_v51 = vadd.f32 %v1163_v15, %v1162_v21  ;;  %v537_v26 = vsel %vm45_vm0, %v2960_v25, 0.0 }
 0x338   :  { %v1165_v47 = vsel %vm45_vm0, %v1156_v32, 0.0  ;;  %v778_v8 = vsel %vm45_vm0, %v751_v43, 0.0  ;;  %v2994_v24 = vmul.f32 %v2916_v3, %v2922_v60  ;;  %v1110_v62 = vsel %vm45_vm0, %v2964_v29, 0.0 }
 0x339   :  { %v1470_v16 = vsub.f32 %v2843_v39, %v2974_v57  ;;  %v1166_v63 = vadd.f32 %v1165_v47, %v1164_v51  ;;  %v779_v1 = vadd.f32 %v778_v8, %v777_v10  ;;  %v1113_v46 = vsel %vm45_vm0, %v2968_v52, 0.0 }
 0x33a   :  { %1978 = vrsqrt.f32 %v1532_v17  ;;  %v3004_v32 = vadd.f32 1e-05, %v1191_v31  ;;  %v1474_v7 = vsub.f32 %v2870_v20, %v2974_v57  ;;  %v846_v21 = vmul.f32 0.25, %v836_v58 }
 0x33b   :  { %v1478_v22 = vsub.f32 %v2904_v6, %v2974_v57  ;;  %v1188_v15 = vmul.f32 0.25, %v1166_v63  ;;  %v3010_v30 = vmul.f32 0.25, %v779_v1  ;;  %v1458_v39 = vsel %vm45_vm0, %v2994_v24, 0.0 }
 0x33c   :  { %v3000_v0 = vpop.permute.xlu1 %1041  ;;  %v510_v10 = vmul.f32 %v2698_v45, %v2950_v11  ;;  %v518_v17 = vmul.f32 %v2782_v9, %v2972_v59  ;;  %v1486_v20 = vmul.f32 %v1470_v16, %v1470_v16  ;;  %v1490_v8 = vmul.f32 %v1474_v7, %v1474_v7 }
 0x33d   :  { %3775 = vst [vmem:[#allocation64_spill] sm:$0xff] %v3010_v30  ;;  %v3020_v31 = vmul.f32 %v2698_v45, %v3000_v0  ;;  %v1192_v58 = vadd.f32 1e-05, %v1188_v15  ;;  %v787_v6 = vsub.f32 %v2738_v61, %v3010_v30  ;;  %v791_v51 = vsub.f32 %v2920_v48, %v3010_v30 }
 0x33e   :  { %v795_v63 = vsub.f32 %v2742_v2, %v3010_v30  ;;  %v799_v1 = vsub.f32 %v751_v43, %v3010_v30  ;;  %v535_v40 = vsel %vm45_vm0, %v510_v10, 0.0  ;;  %v1459_v15 = vadd.f32 %v1458_v39, %v2839_v42 }
 0x33f   :  { %1980 = vrsqrt.f32 %v1192_v58  ;;  %v803_v45 = vmul.f32 %v787_v6, %v787_v6  ;;  %v807_v16 = vmul.f32 %v791_v51, %v791_v51  ;;  %v536_v61 = vadd.f32 %v535_v40, %v534_v13 }
 0x340   :  { %v3026_v47 = vpop.permute.xlu1 %1073  ;;  %v811_v14 = vmul.f32 %v795_v63, %v795_v63  ;;  %v539_v28 = vsel %vm45_vm0, %v518_v17, 0.0  ;;  %v1111_v48 = vsel %vm45_vm0, %v3020_v31, 0.0  ;;  %v815_v7 = vmul.f32 %v799_v1, %v799_v1 }
 0x341   :  { %v837_v3 = vsel %vm45_vm0, %v803_v45, 0.0  ;;  %v838_v2 = vsel %vm45_vm0, %v807_v16, 0.0  ;;  %v1112_v43 = vadd.f32 %v1111_v48, %v1110_v62  ;;  %v850_v30 = vadd.f32 1e-05, %v846_v21 }
 0x342   :  { %v1482_v58 = vsub.f32 %v2911_v44, %v2974_v57  ;;  %v839_v6 = vadd.f32 %v838_v2, %v837_v3  ;;  %v538_v51 = vadd.f32 %v537_v26, %v536_v61  ;;  %v1514_v40 = vsel %vm45_vm0, %v1486_v20, 0.0 }
 0x343   :  { %v840_v13 = vsel %vm45_vm0, %v811_v14, 0.0  ;;  %v1114_v39 = vadd.f32 %v1113_v46, %v1112_v43  ;;  %v1094_v63 = vmul.f32 %v2782_v9, %v3026_v47  ;;  %v1515_v45 = vsel %vm45_vm0, %v1490_v8, 0.0 }
 0x344   :  { %v1979_v1 = vpop.eup %1978  ;;  %v841_v62 = vadd.f32 %v840_v13, %v839_v6  ;;  %v540_v21 = vadd.f32 %v539_v28, %v538_v51  ;;  %v1494_v3 = vmul.f32 %v1478_v22, %v1478_v22  ;;  %v842_v26 = vsel %vm45_vm0, %v815_v7, 0.0 }
 0x345   :  { %v3040_v42 = vpop.permute.xlu1 %1417  ;;  %v1115_v16 = vsel %vm45_vm0, %v1094_v63, 0.0  ;;  %v1461_v20 = vadd.f32 %v2984_v19, %v1459_v15  ;;  %1982 = vrsqrt.f32 %v850_v30  ;;  %v1498_v8 = vmul.f32 %v1482_v58, %v1482_v58 }
 0x346   :  { %v1435_v44 = vmul.f32 %v2725_v41, %v3040_v42  ;;  %v843_v14 = vadd.f32 %v842_v26, %v841_v62  ;;  %v3052_v46 = vmul.f32 0.25, %v540_v21  ;;  %v1116_v61 = vadd.f32 %v1115_v16, %v1114_v39 }
 0x347   :  { %v1516_v48 = vadd.f32 %v1515_v45, %v1514_v40  ;;  %v1517_v15 = vsel %vm45_vm0, %v1494_v3, 0.0 }
 0x348   :  { %v1462_v9 = vsel %vm45_vm0, %v1435_v44, 0.0  ;;  %v847_v2 = vmul.f32 0.25, %v843_v14  ;;  %v554_v41 = vsub.f32 %v2956_v5, %v3052_v46  ;;  %v558_v22 = vsub.f32 %v510_v10, %v3052_v46 }
 0x349   :  { %v1463_v28 = vadd.f32 %v1462_v9, %v1461_v20  ;;  %v562_v7 = vsub.f32 %v2960_v25, %v3052_v46  ;;  %v1981_v19 = vpop.eup %1980  ;;  %v566_v43 = vsub.f32 %v518_v17, %v3052_v46  ;;  %v3062_v6 = vmul.f32 0.25, %v1116_v61 }
 0x34a   :  { %v851_v58 = vadd.f32 1e-05, %v847_v2  ;;  %v570_v51 = vmul.f32 %v554_v41, %v554_v41  ;;  %v574_v40 = vmul.f32 %v558_v22, %v558_v22  ;;  %1204 = vrot.lane.b32.xlu0 %v1981_v19, %s2043_s18  ;;  %v1518_v5 = vadd.f32 %v1517_v15, %v1516_v48 }
 0x34b   :  { %v3064_v30 = vmul.f32 0.25, %v1463_v28  ;;  %v578_v13 = vmul.f32 %v562_v7, %v562_v7  ;;  %v1130_v10 = vsub.f32 %v2964_v29, %v3062_v6  ;;  %v1134_v25 = vsub.f32 %v3020_v31, %v3062_v6 }
 0x34c   :  { %v1138_v17 = vsub.f32 %v2968_v52, %v3062_v6  ;;  %1984 = vrsqrt.f32 %v851_v58  ;;  %v582_v39 = vmul.f32 %v566_v43, %v566_v43  ;;  %v598_v45 = vsel %vm45_vm0, %v570_v51, 0.0 }
 0x34d   :  { %v599_v62 = vsel %vm45_vm0, %v574_v40, 0.0  ;;  %v601_v3 = vsel %vm45_vm0, %v578_v13, 0.0  ;;  %v1142_v26 = vsub.f32 %v1094_v63, %v3062_v6  ;;  %v1146_v16 = vmul.f32 %v1130_v10, %v1130_v10 }
 0x34e   :  { %v600_v21 = vadd.f32 %v599_v62, %v598_v45  ;;  %v1150_v20 = vmul.f32 %v1134_v25, %v1134_v25  ;;  %v1154_v29 = vmul.f32 %v1138_v17, %v1138_v17  ;;  %v1471_v31 = vsub.f32 %v2817_v37, %v3064_v30  ;;  %1544 = vrot.lane.b32.xlu0 %v1979_v1, %s2044_s19 }
 0x34f   :  { %v1475_v52 = vsub.f32 %v2994_v24, %v3064_v30  ;;  %1986 = vrsqrt.f32 %v3004_v32  ;;  %v1174_v61 = vsel %vm45_vm0, %v1146_v16, 0.0  ;;  %v1479_v9 = vsub.f32 %v2929_v54, %v3064_v30  ;;  %v1983_v2 = vpop.eup %1982 }
 0x350   :  { %v602_v14 = vadd.f32 %v601_v3, %v600_v21  ;;  %v603_v63 = vsel %vm45_vm0, %v582_v39, 0.0  ;;  %v1158_v48 = vmul.f32 %v1142_v26, %v1142_v26  ;;  %v1175_v28 = vsel %vm45_vm0, %v1150_v20, 0.0 }
 0x351   :  { %v1483_v37 = vsub.f32 %v1435_v44, %v3064_v30  ;;  %v1519_v24 = vsel %vm45_vm0, %v1498_v8, 0.0  ;;  %v1176_v1 = vadd.f32 %v1175_v28, %v1174_v61  ;;  %v1487_v22 = vmul.f32 %v1471_v31, %v1471_v31  ;;  %v3102_v31 = vld [vmem:[%s3652_s3 + $0x10] sm:$0xff] }
 0x352   :  { %v604_v41 = vadd.f32 %v603_v63, %v602_v14  ;;  %v1520_v32 = vadd.f32 %v1519_v24, %v1518_v5  ;;  %v1177_v7 = vsel %vm45_vm0, %v1154_v29, 0.0  ;;  %v1491_v19 = vmul.f32 %v1475_v52, %v1475_v52  ;;  %864 = vrot.lane.b32.xlu0 %v1983_v2, %s2042_s14 }
 0x353   :  { %v1495_v15 = vmul.f32 %v1479_v9, %v1479_v9  ;;  %v1178_v43 = vadd.f32 %v1177_v7, %v1176_v1  ;;  %v1521_v58 = vsel %vm45_vm0, %v1487_v22, 0.0  ;;  %v1179_v51 = vsel %vm45_vm0, %v1158_v48, 0.0 }
 0x354   :  { %v614_v54 = vmul.f32 0.25, %v604_v41  ;;  %v1499_v44 = vmul.f32 %v1483_v37, %v1483_v37  ;;  %v1522_v40 = vsel %vm45_vm0, %v1491_v19, 0.0  ;;  %v1530_v5 = vmul.f32 0.25, %v1520_v32  ;;  %v3120_v37 = vpop.permute.xlu0 %1340  ;;  %v3133_v41 = vpop.permute.xlu1 %1338  ;;  %v3142_v32 = vld [vmem:[%s3652_s3 + $0x8] sm:$0xff] }
 0x355   :  { %v1180_v13 = vadd.f32 %v1179_v51, %v1178_v43  ;;  %v1523_v10 = vadd.f32 %v1522_v40, %v1521_v58  ;;  %v1524_v17 = vsel %vm45_vm0, %v1495_v15, 0.0  ;;  %3777 = vst [vmem:[#allocation66_spill] sm:$0xff] %v3120_v37 }
 0x356   :  { %v618_v8 = vadd.f32 1e-05, %v614_v54  ;;  %v1985_v25 = vpop.eup %1984  ;;  %v1526_v62 = vsel %vm45_vm0, %v1499_v44, 0.0  ;;  %v1534_v16 = vadd.f32 1e-05, %v1530_v5 }
 0x357   :  { %v1190_v39 = vmul.f32 0.25, %v1180_v13  ;;  %v1525_v45 = vadd.f32 %v1524_v17, %v1523_v10  ;;  %866 = vrot.lane.b32.xlu1 %v1985_v25, %s2042_s14  ;;  %v3778_v25 = vld [vmem:[#allocation8_spill] sm:$0xff]  ;;  %v3779_v17 = vld [vmem:[#allocation31_spill] sm:$0xff] }
 0x358   :  { %1988 = vrsqrt.f32 %v618_v8  ;;  %v3135_v1 = vpop.permute.xlu1 %1342 }
 0x359   :  { %v1987_v21 = vpop.eup %1986  ;;  %v1194_v3 = vadd.f32 1e-05, %v1190_v39  ;;  %v1527_v26 = vadd.f32 %v1526_v62, %v1525_v45  ;;  %v3781_v45 = vld [vmem:[#allocation9_spill] sm:$0xff] }
 0x35b   :  { %1990 = vrsqrt.f32 %v1194_v3  ;;  %v1531_v20 = vmul.f32 0.25, %v1527_v26  ;;  %1210 = vrot.lane.b32.xlu1 %v1987_v21, %s2043_s18  ;;  %v3782_v21 = vld [vmem:[#allocation33_spill] sm:$0xff] }
 0x35c   :  { %1992 = vrsqrt.f32 %v1534_v16  ;;  %v3137_v22 = vpop.permute.xlu1 %1678  ;;  %v3783_v26 = vld [vmem:[#allocation45_spill] sm:$0xff] }
 0x35d   :  { %v1535_v29 = vadd.f32 1e-05, %v1531_v20  ;;  %v3784_v20 = vld [vmem:[#allocation17_spill] sm:$0xff] }
 0x35f   :  { %1994 = vrsqrt.f32 %v1535_v29 }
 0x362   :  { %v1989_v52 = vpop.eup %1988 }
 0x363   :  { %v3105_v14 = vmul.f32 %v1989_v52, %v3102_v31  ;;  %v3785_v52 = vld [vmem:[#allocation11_spill] sm:$0xff] }
 0x365   :  { %v3109_v61 = vmul.f32 %v3105_v14, %v2972_v59  ;;  %v3113_v9 = vmul.f32 %v3105_v14, %v3052_v46  ;;  %v3117_v63 = vmul.f32 %v3105_v14, %v2950_v11  ;;  %v1991_v48 = vpop.eup %1990  ;;  %v3124_v59 = vpop.permute.xlu0 %1676  ;;  %v3129_v46 = vld [vmem:[%s3652_s3] sm:$0xff] }
 0x366   :  { %1208 = vrot.lane.b32.xlu0 %v1991_v48, %s2043_s18  ;;  %v1993_v28 = vpop.eup %1992 }
 0x367   :  { %3776 = vst [vmem:[#allocation65_spill] sm:$0xff] %v3113_v9 }
 0x369   :  { %v1995_v2 = vpop.eup %1994 }
 0x36a   :  { %1548 = vrot.lane.b32.xlu0 %v1993_v28, %s2044_s19  ;;  %1550 = vrot.lane.b32.xlu1 %v1995_v2, %s2044_s19  ;;  %v3786_v28 = vld [vmem:[#allocation34_spill] sm:$0xff] }
 0x377   :  { %v861_v11 = vpop.permute.xlu0 %860 }
 0x378   :  { %v872_v24 = vmul.f32 %v861_v11, %v3129_v46  ;;  %v3787_v11 = vld [vmem:[#allocation42_spill] sm:$0xff] }
 0x37a   :  { %976 = vrot.lane.b32.xlu0 %v872_v24, %s2035_s20  ;;  %v880_v3 = vmul.f32 %v872_v24, %v3782_v21  ;;  %v884_v29 = vmul.f32 %v872_v24, %v3784_v20  ;;  %v888_v2 = vmul.f32 %v872_v24, %v3786_v28  ;;  %v3794_v21 = vld [vmem:[#allocation22_spill] sm:$0xff]  ;;  %v3223_v28 = vld [vmem:[%s3649_s0 + $0x28] sm:$0xff] }
 0x37b   :  { %v3796_v20 = vld [vmem:[#allocation38_spill] sm:$0xff] }
 0x392   :  { %v863_v7 = vpop.permute.xlu1 %862 }
 0x393   :  { %v873_v19 = vmul.f32 %v863_v7, %v3142_v32 }
 0x395   :  { %978 = vrot.lane.b32.xlu1 %v873_v19, %s2035_s20  ;;  %v877_v51 = vmul.f32 %v873_v19, %v2441_v34  ;;  %v881_v44 = vmul.f32 %v873_v19, %v2552_v27  ;;  %v885_v40 = vmul.f32 %v873_v19, %v2435_v33  ;;  %v889_v8 = vmul.f32 %v873_v19, %v2562_v4  ;;  %v3780_v4 = vld [vmem:[#allocation12_spill] sm:$0xff]  ;;  %v3788_v19 = vld [vmem:[#allocation19_spill] sm:$0xff] }
 0x396   :  { %v876_v39 = vmul.f32 %v872_v24, %v3780_v4  ;;  %v3193_v24 = vld [vmem:[%s3652_s3 + $0x18] sm:$0xff]  ;;  %v3792_v4 = vld [vmem:[#allocation16_spill] sm:$0xff] }
 0x3a0   :  { %v1207_v15 = vpop.permute.xlu1 %1206 }
 0x3a1   :  { %v1217_v54 = vmul.f32 %v1207_v15, %v3142_v32 }
 0x3a3   :  { %1322 = vrot.lane.b32.xlu1 %v1217_v54, %s2040_s2  ;;  %v1221_v5 = vmul.f32 %v1217_v54, %v3778_v25  ;;  %v1225_v33 = vmul.f32 %v1217_v54, %v3779_v17  ;;  %v1229_v62 = vmul.f32 %v1217_v54, %v3781_v45  ;;  %v1233_v16 = vmul.f32 %v1217_v54, %v3783_v26  ;;  %v3789_v54 = vld [vmem:[#allocation13_spill] sm:$0xff]  ;;  %v3791_v25 = vld [vmem:[#allocation14_spill] sm:$0xff]  ;;  %v3793_v45 = vld [vmem:[#allocation36_spill] sm:$0xff] }
 0x3a8   :  { %v1547_v43 = vpop.permute.xlu1 %1546 }
 0x3a9   :  { %v1557_v58 = vmul.f32 %v1547_v43, %v3142_v32 }
 0x3ab   :  { %1662 = vrot.lane.b32.xlu1 %v1557_v58, %s2041_s13  ;;  %v1561_v48 = vmul.f32 %v1557_v58, %v3785_v52  ;;  %v1565_v7 = vmul.f32 %v1557_v58, %v3787_v11  ;;  %v1569_v43 = vmul.f32 %v1557_v58, %v3789_v54  ;;  %v3797_v52 = vld [vmem:[#allocation23_spill] sm:$0xff] }
 0x3af   :  { %910 = vrot.lane.b32.xlu1 %v877_v51, %s2035_s20 }
 0x3b3   :  { %918 = vrot.lane.b32.xlu1 %v881_v44, %s2035_s20 }
 0x3b7   :  { %926 = vrot.lane.b32.xlu1 %v885_v40, %s2035_s20  ;;  %v3790_v40 = vld [vmem:[#allocation47_spill] sm:$0xff] }
 0x3bb   :  { %934 = vrot.lane.b32.xlu1 %v889_v8, %s2035_s20  ;;  %v1573_v8 = vmul.f32 %v1557_v58, %v3790_v40  ;;  %v3800_v40 = vld [vmem:[#allocation7_spill] sm:$0xff] }
 0x3bc   :  { %v1205_v13 = vpop.permute.xlu0 %1204 }
 0x3bd   :  { %v1216_v10 = vmul.f32 %v1205_v13, %v3129_v46 }
 0x3bf   :  { %1320 = vrot.lane.b32.xlu0 %v1216_v10, %s2040_s2  ;;  %1254 = vrot.lane.b32.xlu1 %v1221_v5, %s2040_s2  ;;  %v1220_v15 = vmul.f32 %v1216_v10, %v3788_v19  ;;  %v1224_v44 = vmul.f32 %v1216_v10, %v2802_v49  ;;  %v1228_v5 = vmul.f32 %v1216_v10, %v3791_v25 }
 0x3c0   :  { %v1545_v34 = vpop.permute.xlu0 %1544  ;;  %v1232_v58 = vmul.f32 %v1216_v10, %v2540_v55  ;;  %v3795_v55 = vld [vmem:[#allocation18_spill] sm:$0xff] }
 0x3c1   :  { %v1556_v27 = vmul.f32 %v1545_v34, %v3129_v46 }
 0x3c3   :  { %1660 = vrot.lane.b32.xlu0 %v1556_v27, %s2041_s13  ;;  %1262 = vrot.lane.b32.xlu1 %v1225_v33, %s2040_s2  ;;  %v1568_v10 = vmul.f32 %v1556_v27, %v3795_v55 }
 0x3c7   :  { %908 = vrot.lane.b32.xlu0 %v876_v39, %s2035_s20  ;;  %1270 = vrot.lane.b32.xlu1 %v1229_v62, %s2040_s2  ;;  %v1560_v39 = vmul.f32 %v1556_v27, %v3792_v4  ;;  %v1564_v62 = vmul.f32 %v1556_v27, %v3793_v45  ;;  %v3803_v4 = vld [vmem:[#allocation49_spill] sm:$0xff] }
 0x3c9   :  { %v867_v51 = vpop.permute.xlu1 %866 }
 0x3ca   :  { %v875_v13 = vmul.f32 %v867_v51, %v3193_v24 }
 0x3cb   :  { %916 = vrot.lane.b32.xlu0 %v880_v3, %s2035_s20  ;;  %1278 = vrot.lane.b32.xlu1 %v1233_v16, %s2040_s2  ;;  %v865_v16 = vpop.permute.xlu0 %864 }
 0x3cc   :  { %v879_v3 = vmul.f32 %v875_v13, %v3794_v21  ;;  %v883_v26 = vmul.f32 %v875_v13, %v2864_v12  ;;  %v891_v54 = vmul.f32 %v875_v13, %v2892_v38  ;;  %v3801_v38 = vld [vmem:[#allocation24_spill] sm:$0xff] }
 0x3cd   :  { %v1211_v34 = vpop.permute.xlu1 %1210 }
 0x3ce   :  { %v1219_v49 = vmul.f32 %v1211_v34, %v3193_v24 }
 0x3cf   :  { %924 = vrot.lane.b32.xlu0 %v884_v29, %s2035_s20  ;;  %1594 = vrot.lane.b32.xlu1 %v1561_v48, %s2041_s13  ;;  %v1572_v29 = vmul.f32 %v1556_v27, %v3796_v20  ;;  %v887_v48 = vmul.f32 %v875_v13, %v3797_v52  ;;  %v3799_v27 = vld [vmem:[#allocation6_spill] sm:$0xff] }
 0x3d3   :  { %932 = vrot.lane.b32.xlu0 %v888_v2, %s2035_s20  ;;  %1602 = vrot.lane.b32.xlu1 %v1565_v7, %s2041_s13  ;;  %v3798_v2 = vld [vmem:[#allocation39_spill] sm:$0xff] }
 0x3d4   :  { %v509_v11 = vmul.f32 %v3223_v28, %v3798_v2  ;;  %v3232_v7 = vld [vmem:[%s3649_s0 + $0x8] sm:$0xff] }
 0x3d5   :  { %v505_v19 = vmul.f32 %v3232_v7, %v3799_v27 }
 0x3d7   :  { %1252 = vrot.lane.b32.xlu0 %v1220_v15, %s2040_s2  ;;  %1610 = vrot.lane.b32.xlu1 %v1569_v43, %s2041_s13  ;;  %v874_v15 = vmul.f32 %v865_v16, %v3102_v31  ;;  %v528_v43 = vsel %vm45_vm0, %v509_v11, 0.0  ;;  %v527_v51 = vsel %vm45_vm0, %v505_v19, 0.0  ;;  %v3806_v16 = vld [vmem:[#allocation25_spill] sm:$0xff] }
 0x3d8   :  { %v1209_v12 = vpop.permute.xlu0 %1208  ;;  %v1231_v20 = vmul.f32 %v1219_v49, %v3806_v16 }
 0x3d9   :  { %v3250_v25 = vmul.f32 %v1209_v12, %v3102_v31 }
 0x3db   :  { %1260 = vrot.lane.b32.xlu0 %v1224_v44, %s2040_s2  ;;  %1618 = vrot.lane.b32.xlu1 %v1573_v8, %s2041_s13  ;;  %v3245_v44 = vld [vmem:[%s3649_s0 + $0x48] sm:$0xff] }
 0x3dc   :  { %v1551_v17 = vpop.permute.xlu1 %1550  ;;  %v513_v8 = vmul.f32 %v3245_v44, %v3800_v40  ;;  %v1549_v34 = vpop.permute.xlu0 %1548 }
 0x3dd   :  { %v3204_v33 = vmul.f32 %v1551_v17, %v3193_v24  ;;  %v3802_v17 = vld [vmem:[#allocation29_spill] sm:$0xff]  ;;  %v3260_v45 = vmul.f32 %v1549_v34, %v3102_v31  ;;  %v3807_v31 = vld [vmem:[#allocation46_spill] sm:$0xff] }
 0x3de   :  { %v882_v52 = vmul.f32 %v874_v15, %v3807_v31 }
 0x3df   :  { %1268 = vrot.lane.b32.xlu0 %v1228_v5, %s2040_s2  ;;  %982 = vrot.lane.b32.xlu1 %v875_v13, %s2035_s20  ;;  %v1223_v13 = vmul.f32 %v1219_v49, %v3801_v38  ;;  %v529_v5 = vadd.f32 %v528_v43, %v527_v51  ;;  %v3809_v43 = vld [vmem:[#allocation27_spill] sm:$0xff]  ;;  %v3810_v38 = vld [vmem:[#allocation26_spill] sm:$0xff]  ;;  %v1571_v31 = vmul.f32 %v3204_v33, %v2492_v50 }
 0x3e0   :  { %v886_v51 = vmul.f32 %v874_v15, %v3809_v43 }
 0x3e3   :  { %1276 = vrot.lane.b32.xlu0 %v1232_v58, %s2040_s2  ;;  %1326 = vrot.lane.b32.xlu1 %v1219_v49, %s2040_s2  ;;  %v530_v58 = vsel %vm45_vm0, %v513_v8, 0.0 }
 0x3e7   :  { %1592 = vrot.lane.b32.xlu0 %v1560_v39, %s2041_s13  ;;  %1666 = vrot.lane.b32.xlu1 %v3204_v33, %s2041_s13  ;;  %v517_v39 = vmul.f32 %v3803_v4, %v3802_v17 }
 0x3e9   :  { %v532_v55 = vsel %vm45_vm0, %v517_v39, 0.0 }
 0x3eb   :  { %1600 = vrot.lane.b32.xlu0 %v1564_v62, %s2041_s13  ;;  %914 = vrot.lane.b32.xlu1 %v879_v3, %s2035_s20  ;;  %v3804_v62 = vld [vmem:[#allocation41_spill] sm:$0xff]  ;;  %v531_v3 = vadd.f32 %v530_v58, %v529_v5  ;;  %v3811_v58 = vld [vmem:[#allocation51_spill] sm:$0xff] }
 0x3ec   :  { %v1227_v21 = vmul.f32 %v1219_v49, %v3804_v62  ;;  %v508_v4 = vmul.f32 %v2858_v18, %v3811_v58  ;;  %v3813_v62 = vld [vmem:[#allocation48_spill] sm:$0xff] }
 0x3ef   :  { %1608 = vrot.lane.b32.xlu0 %v1568_v10, %s2041_s13  ;;  %922 = vrot.lane.b32.xlu1 %v883_v26, %s2035_s20  ;;  %v3805_v10 = vld [vmem:[#allocation32_spill] sm:$0xff] }
 0x3f0   :  { %v878_v26 = vmul.f32 %v874_v15, %v3805_v10  ;;  %v1567_v10 = vmul.f32 %v3204_v33, %v2922_v60 }
 0x3f3   :  { %1616 = vrot.lane.b32.xlu0 %v1572_v29, %s2041_s13  ;;  %930 = vrot.lane.b32.xlu1 %v887_v48, %s2035_s20  ;;  %v533_v29 = vadd.f32 %v532_v55, %v531_v3  ;;  %v3808_v48 = vld [vmem:[#allocation44_spill] sm:$0xff]  ;;  %v3814_v3 = vld [vmem:[#allocation53_spill] sm:$0xff] }
 0x3f4   :  { %v1235_v12 = vmul.f32 %v1219_v49, %v3808_v48  ;;  %v3812_v49 = vld [vmem:[#allocation15_spill] sm:$0xff]  ;;  %v890_v55 = vmul.f32 %v874_v15, %v3814_v3 }
 0x3f7   :  { %980 = vrot.lane.b32.xlu0 %v874_v15, %s2035_s20  ;;  %938 = vrot.lane.b32.xlu1 %v891_v54, %s2035_s20  ;;  %v3273_v54 = vmul.f32 0.25, %v533_v29  ;;  %v1222_v29 = vmul.f32 %v3250_v25, %v2518_v35 }
 0x3f9   :  { %v553_v5 = vsub.f32 %v505_v19, %v3273_v54  ;;  %v557_v34 = vsub.f32 %v509_v11, %v3273_v54  ;;  %v521_v19 = vsel %vm45_vm0, %v508_v4, 0.0  ;;  %v561_v18 = vsub.f32 %v513_v8, %v3273_v54  ;;  %v3298_v11 = vld [vmem:[%s3649_s0 + $0x40] sm:$0xff] }
 0x3fb   :  { %1324 = vrot.lane.b32.xlu0 %v3250_v25, %s2040_s2  ;;  %1258 = vrot.lane.b32.xlu1 %v1223_v13, %s2040_s2  ;;  %v1563_v13 = vmul.f32 %v3204_v33, %v3810_v38  ;;  %v573_v16 = vmul.f32 %v557_v34, %v557_v34  ;;  %v565_v38 = vsub.f32 %v517_v39, %v3273_v54 }
 0x3fc   :  { %v577_v35 = vmul.f32 %v561_v18, %v561_v18  ;;  %v1575_v34 = vmul.f32 %v3204_v33, %v3040_v42  ;;  %v1234_v18 = vmul.f32 %v3250_v25, %v3026_v47 }
 0x3fd   :  { %v592_v8 = vsel %vm45_vm0, %v573_v16, 0.0 }
 0x3fe   :  { %v594_v39 = vsel %vm45_vm0, %v577_v35, 0.0 }
 0x3ff   :  { %1664 = vrot.lane.b32.xlu0 %v3260_v45, %s2041_s13  ;;  %1266 = vrot.lane.b32.xlu1 %v1227_v21, %s2040_s2  ;;  %v504_v21 = vmul.f32 %v3813_v62, %v3812_v49 }
 0x401   :  { %v520_v60 = vsel %vm45_vm0, %v504_v21, 0.0 }
 0x402   :  { %v522_v48 = vadd.f32 %v521_v19, %v520_v60 }
 0x403   :  { %912 = vrot.lane.b32.xlu0 %v878_v26, %s2035_s20  ;;  %1274 = vrot.lane.b32.xlu1 %v1231_v20, %s2040_s2  ;;  %v569_v26 = vmul.f32 %v553_v5, %v553_v5  ;;  %v3815_v20 = vld [vmem:[#allocation10_spill] sm:$0xff]  ;;  %v1226_v5 = vmul.f32 %v3250_v25, %v3000_v0  ;;  %v3331_v0 = vld [vmem:[%s3650_s4 + $0x18] sm:$0xff] }
 0x404   :  { %v512_v15 = vmul.f32 %v3298_v11, %v3815_v20 }
 0x407   :  { %920 = vrot.lane.b32.xlu0 %v882_v52, %s2035_s20  ;;  %1282 = vrot.lane.b32.xlu1 %v1235_v12, %s2040_s2  ;;  %v591_v52 = vsel %vm45_vm0, %v569_v26, 0.0  ;;  %v3816_v12 = vld [vmem:[#allocation54_spill] sm:$0xff]  ;;  %v1230_v26 = vmul.f32 %v3250_v25, %v2526_v53 }
 0x408   :  { %v516_v43 = vmul.f32 %v2884_v23, %v3816_v12  ;;  %v593_v50 = vadd.f32 %v592_v8, %v591_v52 }
 0x40a   :  { %v525_v23 = vsel %vm45_vm0, %v516_v43, 0.0 }
 0x40b   :  { %928 = vrot.lane.b32.xlu0 %v886_v51, %s2035_s20  ;;  %1598 = vrot.lane.b32.xlu1 %v1563_v13, %s2041_s13  ;;  %v3311_v51 = vpop.permute.xlu1 %978  ;;  %v523_v13 = vsel %vm45_vm0, %v512_v15, 0.0 }
 0x40c   :  { %v524_v62 = vadd.f32 %v523_v13, %v522_v48  ;;  %v3818_v13 = vld [vmem:[#allocation57_spill] sm:$0xff] }
 0x40d   :  { %v1566_v47 = vmul.f32 %v3260_v45, %v3818_v13 }
 0x40e   :  { %v526_v16 = vadd.f32 %v525_v23, %v524_v62 }
 0x40f   :  { %936 = vrot.lane.b32.xlu0 %v890_v55, %s2035_s20  ;;  %1606 = vrot.lane.b32.xlu1 %v1567_v10, %s2041_s13  ;;  %v581_v55 = vmul.f32 %v565_v38, %v565_v38  ;;  %v595_v10 = vadd.f32 %v594_v39, %v593_v50 }
 0x410   :  { %v3338_v60 = vmul.f32 0.25, %v526_v16 }
 0x411   :  { %v596_v42 = vsel %vm45_vm0, %v581_v55, 0.0 }
 0x412   :  { %v597_v33 = vadd.f32 %v596_v42, %v595_v10  ;;  %v552_v8 = vsub.f32 %v504_v21, %v3338_v60  ;;  %v556_v48 = vsub.f32 %v508_v4, %v3338_v60  ;;  %v1570_v4 = vmul.f32 %v3260_v45, %v2542_v36  ;;  %v3360_v10 = vpop.permute.xlu0 %976 }
 0x413   :  { %1256 = vrot.lane.b32.xlu0 %v1222_v29, %s2040_s2  ;;  %1614 = vrot.lane.b32.xlu1 %v1571_v31, %s2041_s13  ;;  %v3817_v31 = vld [vmem:[#allocation37_spill] sm:$0xff]  ;;  %v564_v23 = vsub.f32 %v516_v43, %v3338_v60  ;;  %v3373_v43 = vld [vmem:[%s3650_s4 + $0x10] sm:$0xff] }
 0x414   :  { %v613_v53 = vmul.f32 0.25, %v597_v33  ;;  %v1562_v52 = vmul.f32 %v3260_v45, %v3817_v31  ;;  %v568_v25 = vmul.f32 %v552_v8, %v552_v8  ;;  %v572_v50 = vmul.f32 %v556_v48, %v556_v48  ;;  %3819 = vst [vmem:[#allocation8_spill] sm:$0xff] %v3373_v43  ;;  %v3820_v48 = vld [vmem:[#allocation43_spill] sm:$0xff] }
 0x415   :  { %v1323_v3 = vpop.permute.xlu1 %1322  ;;  %v580_v36 = vmul.f32 %v564_v23, %v564_v23 }
 0x416   :  { %v617_v38 = vadd.f32 1e-05, %v613_v53  ;;  %v584_v21 = vsel %vm45_vm0, %v568_v25, 0.0  ;;  %v585_v62 = vsel %vm45_vm0, %v572_v50, 0.0 }
 0x417   :  { %1264 = vrot.lane.b32.xlu0 %v1226_v5, %s2040_s2  ;;  %1622 = vrot.lane.b32.xlu1 %v1575_v34, %s2041_s13  ;;  %v560_v5 = vsub.f32 %v512_v15, %v3338_v60  ;;  %v586_v39 = vadd.f32 %v585_v62, %v584_v21  ;;  %v1574_v15 = vmul.f32 %v3260_v45, %v2896_v56  ;;  %v589_v56 = vsel %vm45_vm0, %v580_v36, 0.0  ;;  %v3822_v21 = vld [vmem:[#allocation58_spill] sm:$0xff]  ;;  %v3823_v62 = vld [vmem:[#allocation61_spill] sm:$0xff] }
 0x418   :  { %1996 = vrsqrt.f32 %v617_v38  ;;  %v989_v38 = vmul.f32 %v3311_v51, %v3820_v48  ;;  %v3389_v23 = vmul.f32 %v3823_v62, %v3822_v21  ;;  %v3397_v51 = vld [vmem:[%s3649_s0 + $0x18] sm:$0xff] }
 0x419   :  { %v576_v55 = vmul.f32 %v560_v5, %v560_v5  ;;  %v3821_v5 = vld [vmem:[#allocation52_spill] sm:$0xff] }
 0x41a   :  { %v542_v48 = vsel %vm45_vm0, %v3389_v23, 0.0 }
 0x41b   :  { %1272 = vrot.lane.b32.xlu0 %v1230_v26, %s2040_s2  ;;  %1682 = vrot.lane.b32.xlu1 %v3331_v0, %s2041_s13  ;;  %v587_v16 = vsel %vm45_vm0, %v576_v55, 0.0  ;;  %v3824_v55 = vld [vmem:[#allocation2_spill] sm:$0xff] }
 0x41c   :  { %v588_v42 = vadd.f32 %v587_v16, %v586_v39  ;;  %v1009_v39 = vsub.f32 %v989_v38, %v3824_v55  ;;  %v3826_v16 = vld [vmem:[#allocation20_spill] sm:$0xff] }
 0x41d   :  { %v1663_v19 = vpop.permute.xlu1 %1662 }
 0x41e   :  { %v590_v45 = vadd.f32 %v589_v56, %v588_v42  ;;  %v2022_v56 = vld [vmem:[%s3650_s4 + $0x8] sm:$0xff] }
 0x41f   :  { %1280 = vrot.lane.b32.xlu0 %v1234_v18, %s2040_s2 }
 0x420   :  { %v612_v13 = vmul.f32 0.25, %v590_v45 }
 0x421   :  { %v911_v29 = vpop.permute.xlu1 %910 }
 0x422   :  { %v1997_v53 = vpop.eup %1996 }
 0x423   :  { %1596 = vrot.lane.b32.xlu0 %v1562_v52, %s2041_s13  ;;  %v625_v8 = vmul.f32 %v1997_v53, %v3142_v32 }
 0x425   :  { %v3346_v35 = vpop.permute.xlu1 %918  ;;  %v661_v50 = vmul.f32 %v625_v8, %v3273_v54  ;;  %v629_v32 = vmul.f32 %v625_v8, %v3799_v27  ;;  %v3401_v54 = vmul.f32 %v3397_v51, %v3826_v16  ;;  %v633_v62 = vmul.f32 %v625_v8, %v3798_v2 }
 0x427   :  { %1604 = vrot.lane.b32.xlu0 %v1566_v47, %s2041_s13  ;;  %v957_v45 = vadd.f32 %v911_v29, %v629_v32  ;;  %v541_v55 = vsel %vm45_vm0, %v3401_v54, 0.0  ;;  %v3827_v29 = vld [vmem:[#allocation21_spill] sm:$0xff]  ;;  %v961_v2 = vadd.f32 %v3346_v35, %v633_v62 }
 0x429   :  { %v3352_v34 = vpop.permute.xlu1 %926 }
 0x42b   :  { %1612 = vrot.lane.b32.xlu0 %v1570_v4, %s2041_s13  ;;  %v1333_v4 = vmul.f32 %v1323_v3, %v3821_v5  ;;  %v616_v3 = vadd.f32 1e-05, %v612_v13 }
 0x42d   :  { %v3362_v26 = vpop.permute.xlu1 %934  ;;  %v1349_v27 = vsub.f32 %v1333_v4, %v3133_v41  ;;  %1998 = vrsqrt.f32 %v616_v3  ;;  %v3420_v41 = vld [vmem:[%s3649_s0 + $0x58] sm:$0xff]  ;;  %v543_v4 = vadd.f32 %v542_v48, %v541_v55 }
 0x42f   :  { %1620 = vrot.lane.b32.xlu0 %v1574_v15, %s2041_s13  ;;  %v3825_v15 = vld [vmem:[#allocation55_spill] sm:$0xff] }
 0x430   :  { %v1673_v36 = vmul.f32 %v1663_v19, %v3825_v15  ;;  %v665_v19 = vsub.f32 %v661_v50, %v2022_v56  ;;  %v3424_v50 = vmul.f32 %v3420_v41, %v3827_v29  ;;  %v3432_v56 = vld [vmem:[%s3649_s0 + $0x78] sm:$0xff] }
 0x431   :  { %v3368_v33 = vpop.permute.xlu0 %1320  ;;  %v1255_v18 = vpop.permute.xlu1 %1254 }
 0x432   :  { %v1013_v38 = vadd.f32 %v1009_v39, %v665_v19  ;;  %v1689_v5 = vsub.f32 %v1673_v36, %v3137_v22  ;;  %v1301_v13 = vadd.f32 %v1255_v18, %v957_v45  ;;  %v637_v36 = vmul.f32 %v625_v8, %v3800_v40  ;;  %v3828_v19 = vld [vmem:[#allocation40_spill] sm:$0xff] }
 0x433   :  { %1680 = vrot.lane.b32.xlu0 %v3373_v43, %s2041_s13  ;;  %v3436_v45 = vmul.f32 %v3432_v56, %v3828_v19 }
 0x434   :  { %v1353_v22 = vadd.f32 %v1349_v27, %v1013_v38  ;;  %v965_v40 = vadd.f32 %v3352_v34, %v637_v36 }
 0x435   :  { %v3378_v31 = vpop.permute.xlu0 %1660  ;;  %v1263_v52 = vpop.permute.xlu1 %1262 }
 0x436   :  { %v1693_v39 = vadd.f32 %v1689_v5, %v1353_v22  ;;  %v1305_v32 = vadd.f32 %v1263_v52, %v961_v2  ;;  %v641_v5 = vmul.f32 %v625_v8, %v3802_v17  ;;  %v546_v22 = vsel %vm45_vm0, %v3436_v45, 0.0 }
 0x437   :  { %v1999_v36 = vpop.eup %1998 }
 0x438   :  { %v969_v37 = vadd.f32 %v3362_v26, %v641_v5 }
 0x439   :  { %v3383_v47 = vpop.permute.xlu0 %908  ;;  %v1271_v25 = vpop.permute.xlu1 %1270 }
 0x43a   :  { %v1309_v62 = vadd.f32 %v1271_v25, %v965_v40 }
 0x43d   :  { %v3403_v42 = vpop.permute.xlu0 %916  ;;  %v1279_v53 = vpop.permute.xlu1 %1278 }
 0x441   :  { %v3415_v15 = vpop.permute.xlu0 %924  ;;  %v1595_v57 = vpop.permute.xlu1 %1594 }
 0x442   :  { %v1641_v18 = vadd.f32 %v1595_v57, %v1301_v13  ;;  %v544_v57 = vsel %vm45_vm0, %v3424_v50, 0.0 }
 0x443   :  { %v545_v38 = vadd.f32 %v544_v57, %v543_v4  ;;  %v1313_v4 = vadd.f32 %v1279_v53, %v969_v37 }
 0x444   :  { %v1697_v3 = vmul.f32 %v3232_v7, %v1641_v18 }
 0x445   :  { %v3438_v27 = vpop.permute.xlu0 %932  ;;  %v1603_v35 = vpop.permute.xlu1 %1602 }
 0x446   :  { %v1713_v52 = vsub.f32 %v1697_v3, %v1693_v39  ;;  %v1645_v48 = vadd.f32 %v1603_v35, %v1305_v32  ;;  %v547_v32 = vadd.f32 %v546_v22, %v545_v38  ;;  %v624_v35 = vmul.f32 %v1999_v36, %v3129_v46  ;;  %v3830_v38 = vld [vmem:[#allocation62_spill] sm:$0xff]  ;;  %v3831_v22 = vld [vmem:[#allocation3_spill] sm:$0xff] }
 0x447   :  { %v1332_v5 = vmul.f32 %v3368_v33, %v3830_v38 }
 0x448   :  { %v1729_v13 = vmul.f32 0.5, %v1713_v52  ;;  %v1701_v55 = vmul.f32 %v3223_v28, %v1645_v48  ;;  %v3456_v40 = vmul.f32 0.25, %v547_v32  ;;  %v3829_v52 = vld [vmem:[#allocation35_spill] sm:$0xff]  ;;  %v660_v48 = vmul.f32 %v624_v35, %v3338_v60 }
 0x449   :  { %v1253_v2 = vpop.permute.xlu0 %1252  ;;  %v1611_v18 = vpop.permute.xlu1 %1610  ;;  %v988_v37 = vmul.f32 %v3360_v10, %v3829_v52  ;;  %v628_v32 = vmul.f32 %v624_v35, %v3812_v49 }
 0x44a   :  { %v1745_v9 = vadd.f32 %v3232_v7, %v1729_v13  ;;  %v1717_v43 = vsub.f32 %v1701_v55, %v1693_v39  ;;  %v1649_v34 = vadd.f32 %v1611_v18, %v1309_v62  ;;  %v555_v13 = vsub.f32 %v3401_v54, %v3456_v40 }
 0x44b   :  { %v559_v55 = vsub.f32 %v3389_v23, %v3456_v40  ;;  %v1008_v18 = vsub.f32 %v988_v37, %v3831_v22  ;;  %v2026_v23 = vld [vmem:[%s3650_s4] sm:$0xff]  ;;  %v567_v22 = vsub.f32 %v3436_v45, %v3456_v40 }
 0x44c   :  { %1761 = vst.msk [vmem:[%s3653_s5 + $0x8] sm:$0xff] %vm45_vm0, %v1745_v9  ;;  %v1733_v17 = vmul.f32 0.5, %v1717_v43  ;;  %v1705_v8 = vmul.f32 %v3245_v44, %v1649_v34  ;;  %v2025_v43 = vld [vmem:[%s3649_s0 + $0x68] sm:$0xff]  ;;  %v3832_v34 = vld [vmem:[#allocation50_spill] sm:$0xff]  ;;  %v664_v54 = vsub.f32 %v660_v48, %v2026_v23  ;;  %v571_v49 = vmul.f32 %v555_v13, %v555_v13 }
 0x44d   :  { %v1261_v25 = vpop.permute.xlu0 %1260  ;;  %v1619_v3 = vpop.permute.xlu1 %1618  ;;  %v1672_v36 = vmul.f32 %v3378_v31, %v3832_v34  ;;  %v956_v31 = vadd.f32 %v3383_v47, %v628_v32  ;;  %v636_v48 = vmul.f32 %v624_v35, %v3815_v20  ;;  %v640_v20 = vmul.f32 %v624_v35, %v3816_v12  ;;  %v2028_v32 = vld [vmem:[%s3649_s0 + $0x20] sm:$0xff] }
 0x44e   :  { %v1749_v26 = vadd.f32 %v3223_v28, %v1733_v17  ;;  %v1721_v7 = vsub.f32 %v1705_v8, %v1693_v39  ;;  %v1653_v57 = vadd.f32 %v1619_v3, %v1313_v4  ;;  %v575_v8 = vmul.f32 %v559_v55, %v559_v55 }
 0x44f   :  { %v1012_v3 = vadd.f32 %v1008_v18, %v664_v54 }
 0x450   :  { %1765 = vst.msk [vmem:[%s3653_s5 + $0x28] sm:$0xff] %vm45_vm0, %v1749_v26  ;;  %v1737_v9 = vmul.f32 0.5, %v1721_v7  ;;  %v1709_v46 = vmul.f32 %v2025_v43, %v1653_v57  ;;  %v1688_v26 = vsub.f32 %v1672_v36, %v3124_v59  ;;  %v632_v7 = vmul.f32 %v624_v35, %v3811_v58 }
 0x451   :  { %v1269_v53 = vpop.permute.xlu0 %1268  ;;  %v3467_v28 = vpop.permute.xlu1 %982  ;;  %v1300_v57 = vadd.f32 %v1253_v2, %v956_v31  ;;  %v605_v59 = vsel %vm45_vm0, %v571_v49, 0.0  ;;  %v606_v58 = vsel %vm45_vm0, %v575_v8, 0.0 }
 0x452   :  { %v1753_v10 = vadd.f32 %v3245_v44, %v1737_v9  ;;  %v1725_v62 = vsub.f32 %v1709_v46, %v1693_v39  ;;  %v3833_v39 = vld [vmem:[#allocation60_spill] sm:$0xff]  ;;  %v960_v47 = vadd.f32 %v3403_v42, %v632_v7  ;;  %v563_v46 = vsub.f32 %v3424_v50, %v3456_v40 }
 0x453   :  { %v1348_v4 = vsub.f32 %v1332_v5, %v3833_v39  ;;  %v2027_v5 = vld [vmem:[%s3649_s0] sm:$0xff]  ;;  %v964_v42 = vadd.f32 %v3415_v15, %v636_v48  ;;  %v607_v34 = vadd.f32 %v606_v58, %v605_v59  ;;  %v968_v15 = vadd.f32 %v3438_v27, %v640_v20 }
 0x454   :  { %1769 = vst.msk [vmem:[%s3653_s5 + $0x48] sm:$0xff] %vm45_vm0, %v1753_v10  ;;  %v1741_v44 = vmul.f32 0.5, %v1725_v62  ;;  %v1304_v38 = vadd.f32 %v1261_v25, %v960_v47  ;;  %v579_v18 = vmul.f32 %v563_v46, %v563_v46 }
 0x455   :  { %v1277_v60 = vpop.permute.xlu0 %1276  ;;  %v3485_v33 = vpop.permute.xlu1 %1326  ;;  %v1352_v9 = vadd.f32 %v1348_v4, %v1012_v3  ;;  %v1308_v25 = vadd.f32 %v1269_v53, %v964_v42 }
 0x456   :  { %v1757_v17 = vadd.f32 %v2025_v43, %v1741_v44  ;;  %v608_v45 = vsel %vm45_vm0, %v579_v18, 0.0  ;;  %v1312_v8 = vadd.f32 %v1277_v60, %v968_v15 }
 0x457   :  { %v1692_v2 = vadd.f32 %v1688_v26, %v1352_v9  ;;  %v609_v49 = vadd.f32 %v608_v45, %v607_v34  ;;  %v2029_v9 = vld [vmem:[%s3649_s0 + $0x60] sm:$0xff] }
 0x458   :  { %1773 = vst.msk [vmem:[%s3653_s5 + $0x68] sm:$0xff] %vm45_vm0, %v1757_v17  ;;  %v583_v17 = vmul.f32 %v567_v22, %v567_v22 }
 0x459   :  { %v1593_v52 = vpop.permute.xlu0 %1592  ;;  %v3498_v37 = vpop.permute.xlu1 %1666 }
 0x45a   :  { %v1640_v43 = vadd.f32 %v1593_v52, %v1300_v57  ;;  %v610_v57 = vsel %vm45_vm0, %v583_v17, 0.0 }
 0x45b   :  { %v611_v52 = vadd.f32 %v610_v57, %v609_v49  ;;  %v3835_v49 = vld [vmem:[#allocation56_spill] sm:$0xff] }
 0x45c   :  { %v1696_v10 = vmul.f32 %v2027_v5, %v1640_v43 }
 0x45d   :  { %v1601_v62 = vpop.permute.xlu0 %1600  ;;  %v3509_v13 = vpop.permute.xlu1 %914  ;;  %v615_v48 = vmul.f32 0.25, %v611_v52 }
 0x45e   :  { %v1712_v55 = vsub.f32 %v1696_v10, %v1692_v2  ;;  %v1644_v50 = vadd.f32 %v1601_v62, %v1304_v38 }
 0x45f   :  { %v619_v42 = vadd.f32 1e-05, %v615_v48 }
 0x460   :  { %v1728_v36 = vmul.f32 0.5, %v1712_v55  ;;  %v1700_v44 = vmul.f32 %v2028_v32, %v1644_v50 }
 0x461   :  { %v1609_v23 = vpop.permute.xlu0 %1608  ;;  %v923_v54 = vpop.permute.xlu1 %922  ;;  %2000 = vrsqrt.f32 %v619_v42 }
 0x462   :  { %v1744_v39 = vadd.f32 %v2027_v5, %v1728_v36  ;;  %v1716_v4 = vsub.f32 %v1700_v44, %v1692_v2  ;;  %v1648_v31 = vadd.f32 %v1609_v23, %v1308_v25  ;;  %v3834_v23 = vld [vmem:[#allocation64_spill] sm:$0xff] }
 0x463   :  { %v991_v15 = vmul.f32 %v3467_v28, %v3834_v23 }
 0x464   :  { %1760 = vst.msk [vmem:[%s3653_s5] sm:$0xff] %vm45_vm0, %v1744_v39  ;;  %v1732_v12 = vmul.f32 0.5, %v1716_v4  ;;  %v1704_v35 = vmul.f32 %v3298_v11, %v1648_v31 }
 0x465   :  { %v1617_v53 = vpop.permute.xlu0 %1616  ;;  %v931_v3 = vpop.permute.xlu1 %930 }
 0x466   :  { %v1748_v26 = vadd.f32 %v2028_v32, %v1732_v12  ;;  %v1720_v27 = vsub.f32 %v1704_v35, %v1692_v2  ;;  %v1652_v7 = vadd.f32 %v1617_v53, %v1312_v8  ;;  %v1335_v8 = vmul.f32 %v3485_v33, %v3835_v49  ;;  %v3836_v35 = vld [vmem:[#allocation4_spill] sm:$0xff] }
 0x467   :  { %v1011_v53 = vsub.f32 %v991_v15, %v3836_v35 }
 0x468   :  { %1764 = vst.msk [vmem:[%s3653_s5 + $0x20] sm:$0xff] %vm45_vm0, %v1748_v26  ;;  %v1736_v60 = vmul.f32 0.5, %v1720_v27  ;;  %v1708_v47 = vmul.f32 %v2029_v9, %v1652_v7 }
 0x469   :  { %v3533_v43 = vpop.permute.xlu0 %980  ;;  %v939_v46 = vpop.permute.xlu1 %938 }
 0x46a   :  { %v1752_v59 = vadd.f32 %v3298_v11, %v1736_v60  ;;  %v1724_v58 = vsub.f32 %v1708_v47, %v1692_v2 }
 0x46b   :  { %v2001_v25 = vpop.eup %2000 }
 0x46c   :  { %1768 = vst.msk [vmem:[%s3653_s5 + $0x40] sm:$0xff] %vm45_vm0, %v1752_v59  ;;  %v1740_v38 = vmul.f32 0.5, %v1724_v58  ;;  %v627_v36 = vmul.f32 %v2001_v25, %v3193_v24 }
 0x46d   :  { %v3540_v5 = vpop.permute.xlu0 %1324  ;;  %v1259_v10 = vpop.permute.xlu1 %1258 }
 0x46e   :  { %v1756_v62 = vadd.f32 %v2029_v9, %v1740_v38  ;;  %v663_v39 = vmul.f32 %v627_v36, %v3456_v40  ;;  %v631_v4 = vmul.f32 %v627_v36, %v3826_v16  ;;  %v635_v45 = vmul.f32 %v627_v36, %v3822_v21 }
 0x46f   :  { %v639_v24 = vmul.f32 %v627_v36, %v3827_v29  ;;  %v643_v12 = vmul.f32 %v627_v36, %v3828_v19  ;;  %v1351_v21 = vsub.f32 %v1335_v8, %v3135_v1  ;;  %v1675_v19 = vmul.f32 %v3498_v37, %v3064_v30  ;;  %v2030_v1 = vld [vmem:[%s3649_s0 + $0x38] sm:$0xff] }
 0x470   :  { %1772 = vst.msk [vmem:[%s3653_s5 + $0x60] sm:$0xff] %vm45_vm0, %v1756_v62  ;;  %v959_v28 = vadd.f32 %v3509_v13, %v631_v4  ;;  %v963_v26 = vadd.f32 %v923_v54, %v635_v45  ;;  %v667_v16 = vsub.f32 %v663_v39, %v3331_v0  ;;  %v3838_v45 = vld [vmem:[#allocation28_spill] sm:$0xff] }
 0x471   :  { %v3546_v55 = vpop.permute.xlu0 %1664  ;;  %v1267_v11 = vpop.permute.xlu1 %1266  ;;  %v967_v40 = vadd.f32 %v931_v3, %v639_v24  ;;  %v971_v27 = vadd.f32 %v939_v46, %v643_v12  ;;  %v630_v49 = vmul.f32 %v3105_v14, %v3838_v45  ;;  %v1334_v24 = vmul.f32 %v3540_v5, %v3062_v6  ;;  %v3839_v12 = vld [vmem:[#allocation30_spill] sm:$0xff] }
 0x472   :  { %v1303_v7 = vadd.f32 %v1259_v10, %v959_v28  ;;  %v1307_v60 = vadd.f32 %v1267_v11, %v963_v26  ;;  %v1015_v29 = vadd.f32 %v1011_v53, %v667_v16  ;;  %v638_v35 = vmul.f32 %v3105_v14, %v3839_v12  ;;  %v3840_v53 = vld [vmem:[#allocation5_spill] sm:$0xff]  ;;  %v3841_v16 = vld [vmem:[#allocation8_spill] sm:$0xff] }
 0x474   :  { %v1355_v58 = vadd.f32 %v1351_v21, %v1015_v29  ;;  %v3843_v21 = vld [vmem:[#allocation66_spill] sm:$0xff] }
 0x475   :  { %v3548_v2 = vpop.permute.xlu0 %912  ;;  %v1275_v50 = vpop.permute.xlu1 %1274  ;;  %v1350_v14 = vsub.f32 %v1334_v24, %v3843_v21 }
 0x476   :  { %v1311_v33 = vadd.f32 %v1275_v50, %v967_v40  ;;  %v958_v26 = vadd.f32 %v3548_v2, %v630_v49 }
 0x479   :  { %v3550_v22 = vpop.permute.xlu0 %920  ;;  %v1283_v18 = vpop.permute.xlu1 %1282 }
 0x47a   :  { %v1315_v9 = vadd.f32 %v1283_v18, %v971_v27  ;;  %v962_v40 = vadd.f32 %v3550_v22, %v3117_v63 }
 0x47d   :  { %v3552_v34 = vpop.permute.xlu0 %928  ;;  %v1599_v20 = vpop.permute.xlu1 %1598 }
 0x47e   :  { %v1643_v47 = vadd.f32 %v1599_v20, %v1303_v7  ;;  %v966_v27 = vadd.f32 %v3552_v34, %v638_v35  ;;  %v3842_v7 = vld [vmem:[#allocation65_spill] sm:$0xff] }
 0x480   :  { %v1699_v48 = vmul.f32 %v3397_v51, %v1643_v47  ;;  %v3844_v47 = vld [vmem:[#allocation63_spill] sm:$0xff] }
 0x481   :  { %v3555_v32 = vpop.permute.xlu0 %936  ;;  %v1607_v44 = vpop.permute.xlu1 %1606  ;;  %v1674_v63 = vmul.f32 %v3546_v55, %v3844_v47  ;;  %v2033_v55 = vld [vmem:[%s3649_s0 + $0x50] sm:$0xff] }
 0x482   :  { %v1647_v59 = vadd.f32 %v1607_v44, %v1307_v60 }
 0x484   :  { %v1703_v38 = vmul.f32 %v2030_v1, %v1647_v59 }
 0x485   :  { %v3561_v31 = vpop.permute.xlu0 %1256  ;;  %v1615_v17 = vpop.permute.xlu1 %1614 }
 0x486   :  { %v1651_v13 = vadd.f32 %v1615_v17, %v1311_v33  ;;  %v1302_v6 = vadd.f32 %v3561_v31, %v958_v26  ;;  %v2031_v31 = vld [vmem:[%s3649_s0 + $0x10] sm:$0xff] }
 0x488   :  { %v1707_v10 = vmul.f32 %v3420_v41, %v1651_v13 }
 0x489   :  { %v1265_v57 = vpop.permute.xlu0 %1264  ;;  %v1623_v52 = vpop.permute.xlu1 %1622 }
 0x48a   :  { %v1655_v54 = vadd.f32 %v1623_v52, %v1315_v9  ;;  %v666_v52 = vsub.f32 %v3842_v7, %v3841_v16  ;;  %v1306_v60 = vadd.f32 %v1265_v57, %v962_v40  ;;  %v2032_v57 = vld [vmem:[%s3649_s0 + $0x30] sm:$0xff] }
 0x48c   :  { %v1711_v62 = vmul.f32 %v3432_v56, %v1655_v54 }
 0x48d   :  { %v1273_v3 = vpop.permute.xlu0 %1272  ;;  %v1683_v46 = vpop.permute.xlu1 %1682 }
 0x48e   :  { %v1691_v0 = vsub.f32 %v1675_v19, %v1683_v46  ;;  %v1310_v33 = vadd.f32 %v1273_v3, %v966_v27  ;;  %v2034_v46 = vld [vmem:[%s3649_s0 + $0x70] sm:$0xff] }
 0x490   :  { %v1695_v42 = vadd.f32 %v1691_v0, %v1355_v58 }
 0x491   :  { %v1281_v30 = vpop.permute.xlu0 %1280 }
 0x492   :  { %v1715_v37 = vsub.f32 %v1699_v48, %v1695_v42  ;;  %v1719_v11 = vsub.f32 %v1703_v38, %v1695_v42  ;;  %v1723_v50 = vsub.f32 %v1707_v10, %v1695_v42  ;;  %v1727_v18 = vsub.f32 %v1711_v62, %v1695_v42 }
 0x494   :  { %v1731_v20 = vmul.f32 0.5, %v1715_v37  ;;  %v1735_v25 = vmul.f32 0.5, %v1719_v11  ;;  %v1739_v36 = vmul.f32 0.5, %v1723_v50  ;;  %v1743_v44 = vmul.f32 0.5, %v1727_v18 }
 0x495   :  { %v1597_v23 = vpop.permute.xlu0 %1596 }
 0x496   :  { %v1747_v15 = vadd.f32 %v3397_v51, %v1731_v20  ;;  %v1751_v39 = vadd.f32 %v2030_v1, %v1735_v25  ;;  %v1755_v4 = vadd.f32 %v3420_v41, %v1739_v36  ;;  %v1759_v17 = vadd.f32 %v3432_v56, %v1743_v44  ;;  %v3837_v41 = vld [vmem:[#allocation59_spill] sm:$0xff] }
 0x497   :  { %v990_v56 = vmul.f32 %v3533_v43, %v3837_v41  ;;  %v970_v43 = vadd.f32 %v3555_v32, %v3109_v61  ;;  %v1642_v29 = vadd.f32 %v1597_v23, %v1302_v6 }
 0x498   :  { %1763 = vst.msk [vmem:[%s3653_s5 + $0x18] sm:$0xff] %vm45_vm0, %v1747_v15  ;;  %1767 = vst.msk [vmem:[%s3653_s5 + $0x38] sm:$0xff] %vm45_vm0, %v1751_v39 }
 0x499   :  { %1771 = vst.msk [vmem:[%s3653_s5 + $0x58] sm:$0xff] %vm45_vm0, %v1755_v4  ;;  %1775 = vst.msk [vmem:[%s3653_s5 + $0x78] sm:$0xff] %vm45_vm0, %v1759_v17  ;;  %v1605_v51 = vpop.permute.xlu0 %1604  ;;  %v1010_v28 = vsub.f32 %v990_v56, %v3840_v53  ;;  %v1314_v9 = vadd.f32 %v1281_v30, %v970_v43  ;;  %v1698_v13 = vmul.f32 %v2031_v31, %v1642_v29 }
 0x49a   :  { %v1646_v22 = vadd.f32 %v1605_v51, %v1306_v60 }
 0x49b   :  { %v1014_v2 = vadd.f32 %v1010_v28, %v666_v52 }
 0x49c   :  { %v1702_v54 = vmul.f32 %v2032_v57, %v1646_v22 }
 0x49d   :  { %v1613_v8 = vpop.permute.xlu0 %1612  ;;  %v1354_v32 = vadd.f32 %v1350_v14, %v1014_v2 }
 0x49e   :  { %v1650_v34 = vadd.f32 %v1613_v8, %v1310_v33 }
 0x4a0   :  { %v1706_v3 = vmul.f32 %v2033_v55, %v1650_v34 }
 0x4a1   :  { %v1621_v5 = vpop.permute.xlu0 %1620 }
 0x4a2   :  { %v1654_v19 = vadd.f32 %v1621_v5, %v1314_v9 }
 0x4a4   :  { %v1710_v58 = vmul.f32 %v2034_v46, %v1654_v19 }
 0x4a5   :  { %v1681_v61 = vpop.permute.xlu0 %1680 }
 0x4a6   :  { %v1690_v59 = vsub.f32 %v1674_v63, %v1681_v61 }
 0x4a8   :  { %v1694_v0 = vadd.f32 %v1690_v59, %v1354_v32 }
 0x4aa   :  { %v1714_v48 = vsub.f32 %v1698_v13, %v1694_v0  ;;  %v1718_v1 = vsub.f32 %v1702_v54, %v1694_v0  ;;  %v1722_v38 = vsub.f32 %v1706_v3, %v1694_v0  ;;  %v1726_v10 = vsub.f32 %v1710_v58, %v1694_v0 }
 0x4ac   :  { %v1730_v62 = vmul.f32 0.5, %v1714_v48  ;;  %v1734_v42 = vmul.f32 0.5, %v1718_v1  ;;  %v1738_v30 = vmul.f32 0.5, %v1722_v38  ;;  %v1742_v37 = vmul.f32 0.5, %v1726_v10 }
 0x4ae   :  { %v1746_v11 = vadd.f32 %v2031_v31, %v1730_v62  ;;  %v1750_v50 = vadd.f32 %v2032_v57, %v1734_v42  ;;  %v1754_v18 = vadd.f32 %v2033_v55, %v1738_v30  ;;  %v1758_v20 = vadd.f32 %v2034_v46, %v1742_v37 }
 0x4b0   :  { %1762 = vst.msk [vmem:[%s3653_s5 + $0x10] sm:$0xff] %vm45_vm0, %v1746_v11  ;;  %1766 = vst.msk [vmem:[%s3653_s5 + $0x30] sm:$0xff] %vm45_vm0, %v1750_v50 }
 0x4b1   :  { %1770 = vst.msk [vmem:[%s3653_s5 + $0x50] sm:$0xff] %vm45_vm0, %v1754_v18  ;;  %1774 = vst.msk [vmem:[%s3653_s5 + $0x70] sm:$0xff] %vm45_vm0, %v1758_v20 }

</bundles_post_ra>
